<compile_context>
chip_gen: v7x
topology: tpu7x:2x2x1
jax: 0.10.0
libtpu: 0.0.40
codegen_flags: <defaults>
</compile_context>

<pallas_src>
import functools

import jax
import jax.numpy as jnp
from jax import lax
from jax.experimental import pallas as pl
from jax.experimental.pallas import tpu as pltpu


def _round_up(x, m):
    return ((x + m - 1) // m) * m


# --------------------------------------------------------------------------
# Generic tiled matmul + bias kernel (used for the hoisted layer-1 input
# projection and the deferred FC projection).  Pads M to a multiple of 8 and
# N to a multiple of 128 so stores are lane-dense / sublane-full.
# --------------------------------------------------------------------------
def _matmul_bias_kernel(x_ref, w_ref, b_ref, o_ref):
    o_ref[...] = (
        jnp.dot(x_ref[...], w_ref[...], preferred_element_type=jnp.float32)
        + b_ref[...]
    ).astype(o_ref.dtype)


def pallas_matmul_bias(x, w, b):
    """out = x @ w + b.  x: (M, K), w: (K, N), b: (N,) or (1, N)."""
    M, K = x.shape
    Kw, N = w.shape
    assert K == Kw
    b = jnp.asarray(b).reshape(1, N)

    m8 = _round_up(M, 8)
    n128 = _round_up(N, 128)
    tm = 128 if m8 >= 128 else m8
    tn = 256 if n128 >= 256 else n128
    Mp = _round_up(m8, tm)
    Np = _round_up(n128, tn)

    if Mp != M:
        x = jnp.pad(x, ((0, Mp - M), (0, 0)))
    if Np != N:
        w = jnp.pad(w, ((0, 0), (0, Np - N)))
        b = jnp.pad(b, ((0, 0), (0, Np - N)))

    out = pl.pallas_call(
        _matmul_bias_kernel,
        out_shape=jax.ShapeDtypeStruct((Mp, Np), jnp.float32),
        grid_spec=pltpu.PrefetchScalarGridSpec(
            num_scalar_prefetch=0,
            grid=(Mp // tm, Np // tn),
            in_specs=[
                pl.BlockSpec((tm, K), lambda i, j: (i, 0)),
                pl.BlockSpec((K, tn), lambda i, j: (0, j)),
                pl.BlockSpec((1, tn), lambda i, j: (0, j)),
            ],
            out_specs=pl.BlockSpec((tm, tn), lambda i, j: (i, j)),
        ),
        compiler_params=pltpu.CompilerParams(
            # Both axes independent -> lets v7x shard over its 2 TensorCores.
            dimension_semantics=("parallel", "parallel"),
        ),
    )(x, w, b)
    return out[:M, :N]


# --------------------------------------------------------------------------
# Time-chunked 2-layer LSTM recurrence kernel.  Only the recurrent matmuls
# (h @ W_hh1 and [h1, h2] @ [W_ih2; W_hh2]) remain on the serial critical path.
# --------------------------------------------------------------------------
def _lstm2_recurrence_kernel(
    pre1_ref,    # (Tc, Bp, 4H)  precomputed layer-1 input gates (x@Wih1^T + b1)
    whh1_ref,    # (H, 4H)       layer-1 recurrent weights (pre-transposed)
    w2_ref,      # (2H, 4H)      stacked [W_ih2^T ; W_hh2^T] (fused layer-2 matmul)
    b2_ref,      # (1, 4H)       layer-2 combined bias
    h2seq_ref,   # (Tc, Bp, H)   out: layer-2 hidden sequence for this chunk
    hn_ref,      # (2, Bp, H)    out: final hidden state (written on last chunk)
    cn_ref,      # (2, Bp, H)    out: final cell state
    h_sc,        # VMEM scratch (2, Bp, H): resident hidden state across chunks
    c_sc,        # VMEM scratch (2, Bp, H): resident cell state across chunks
    *,
    seq_len,
    t_chunk,
    padded_len,
):
    tc = pl.program_id(0)

    @pl.when(tc == 0)
    def _():
        # PyTorch defaults h0 = c0 = 0 when hidden=None.
        h_sc[...] = jnp.zeros_like(h_sc)
        c_sc[...] = jnp.zeros_like(c_sc)

    whh1 = whh1_ref[...]
    w2 = w2_ref[...]
    b2 = b2_ref[...]
    need_mask = padded_len != seq_len  # static

    def gate_math(gates, c):
        # Gate order i, f, g, o (PyTorch convention).
        # Note: with H not a multiple of 128 the split slices cross lane tiles
        # (XLU relayouts); negligible here, and free for realistic H>=128.
        i_g, f_g, g_g, o_g = jnp.split(gates, 4, axis=-1)
        c_new = jax.nn.sigmoid(f_g) * c + jax.nn.sigmoid(i_g) * jnp.tanh(g_g)
        h_new = jax.nn.sigmoid(o_g) * jnp.tanh(c_new)
        return h_new, c_new

    def step(s, carry):
        h1, c1, h2, c2 = carry
        # Layer 1: input projection was hoisted; only the recurrent dot remains.
        gates1 = pre1_ref[s] + jnp.dot(h1, whh1, preferred_element_type=jnp.float32)
        h1n, c1n = gate_math(gates1, c1)
        # TODO(synk): nn.LSTM inter-layer dropout and the output nn.Dropout are
        # train-only; identity here (eval-mode semantics).
        # Layer 2: fused input+recurrent matmul (single MXU push per step).
        xh = jnp.concatenate([h1n, h2], axis=-1)                     # (Bp, 2H)
        gates2 = jnp.dot(xh, w2, preferred_element_type=jnp.float32) + b2
        h2n, c2n = gate_math(gates2, c2)
        h2seq_ref[s] = h2n
        if need_mask:
            # Steps beyond the true sequence length must not advance the state.
            valid = (tc * t_chunk + s) < seq_len
            h1n = jnp.where(valid, h1n, h1)
            c1n = jnp.where(valid, c1n, c1)
            h2n = jnp.where(valid, h2n, h2)
            c2n = jnp.where(valid, c2n, c2)
        return (h1n, c1n, h2n, c2n)

    carry0 = (h_sc[0], c_sc[0], h_sc[1], c_sc[1])
    h1, c1, h2, c2 = lax.fori_loop(
        0, t_chunk, step, carry0, unroll=(t_chunk <= 32))

    h_sc[0] = h1
    c_sc[0] = c1
    h_sc[1] = h2
    c_sc[1] = c2

    @pl.when(tc == pl.num_programs(0) - 1)
    def _():
        hn_ref[0] = h1
        hn_ref[1] = h2
        cn_ref[0] = c1
        cn_ref[1] = c2


# --------------------------------------------------------------------------
# Forward pass wrapper (matches LSTM2Model.forward with hidden=None).
# --------------------------------------------------------------------------
def lstm2_forward(token_ids, params, *, t_chunk=16):
    """token_ids: (B, T) int32.  Returns (logits (B,T,V), (h_n (2,B,H), c_n (2,B,H)))."""
    emb = params["embedding"]                  # (V, E)
    B, T = token_ids.shape
    V, E = emb.shape
    H = params["w_hh_l0"].shape[1]             # w_hh: (4H, H)

    Bp = _round_up(B, 8)                       # sublane-full batch for f32
    Tc = min(t_chunk, T)
    Tp = _round_up(T, Tc)

    tok = token_ids
    if Bp != B:
        tok = jnp.pad(tok, ((0, Bp - B), (0, 0)))   # padded rows sliced off at the end

    # Embedding gather, produced TIME-MAJOR (T, Bp, E) directly (only the tiny
    # int token matrix is transposed -> no full activation transpose in HBM).
    # TODO(synk): the gather itself stays in XLA; it could be fused into a
    # kernel via scalar-prefetched token ids + pl.Element row-gather.
    x_tbe = jnp.take(emb, tok.T, axis=0).astype(jnp.float32)          # (T, Bp, E)

    # Hoisted layer-1 input projection: one big lane-dense matmul.
    wih1_t = params["w_ih_l0"].T                                      # (E, 4H)
    b1 = (params["b_ih_l0"] + params["b_hh_l0"]).reshape(1, 4 * H)
    pre1 = pallas_matmul_bias(x_tbe.reshape(T * Bp, E), wih1_t, b1)   # (T*Bp, 4H)
    pre1 = pre1.reshape(T, Bp, 4 * H)
    if Tp != T:
        pre1 = jnp.pad(pre1, ((0, Tp - T), (0, 0), (0, 0)))

    whh1_t = params["w_hh_l0"].T                                      # (H, 4H)
    w2_t = jnp.concatenate(
        [params["w_ih_l1"].T, params["w_hh_l1"].T], axis=0)           # (2H, 4H)
    b2 = (params["b_ih_l1"] + params["b_hh_l1"]).reshape(1, 4 * H)

    kernel = functools.partial(
        _lstm2_recurrence_kernel, seq_len=T, t_chunk=Tc, padded_len=Tp)

    h2seq, h_n, c_n = pl.pallas_call(
        kernel,
        out_shape=(
            jax.ShapeDtypeStruct((Tp, Bp, H), jnp.float32),   # layer-2 hidden seq
            jax.ShapeDtypeStruct((2, Bp, H), jnp.float32),    # h_n
            jax.ShapeDtypeStruct((2, Bp, H), jnp.float32),    # c_n
        ),
        grid_spec=pltpu.PrefetchScalarGridSpec(
            num_scalar_prefetch=0,
            grid=(Tp // Tc,),
            in_specs=[
                pl.BlockSpec((Tc, Bp, 4 * H), lambda i: (i, 0, 0)),   # pre-gates chunk
                pl.BlockSpec((H, 4 * H), lambda i: (0, 0)),           # W_hh1
                pl.BlockSpec((2 * H, 4 * H), lambda i: (0, 0)),       # [W_ih2;W_hh2]
                pl.BlockSpec((1, 4 * H), lambda i: (0, 0)),           # b2
            ],
            out_specs=[
                pl.BlockSpec((Tc, Bp, H), lambda i: (i, 0, 0)),
                pl.BlockSpec((2, Bp, H), lambda i: (0, 0, 0)),
                pl.BlockSpec((2, Bp, H), lambda i: (0, 0, 0)),
            ],
            scratch_shapes=[
                pltpu.VMEM((2, Bp, H), jnp.float32),   # h state (layer 0, 1)
                pltpu.VMEM((2, Bp, H), jnp.float32),   # c state
            ],
        ),
        compiler_params=pltpu.CompilerParams(
            dimension_semantics=("arbitrary",),   # time recurrence is serial
        ),
    )(pre1, whh1_t, w2_t, b2)

    # Deferred FC projection: one lane-dense (B*T, H) @ (H, V) matmul, output
    # is batch-first (B, T, V) directly.  Only the small (T,B,H) sequence is
    # transposed here.
    h2_bth = jnp.transpose(h2seq[:T, :B], (1, 0, 2))                  # (B, T, H)
    logits = pallas_matmul_bias(
        h2_bth.reshape(B * T, H), params["fc_w"].T, params["fc_b"])
    logits = logits.reshape(B, T, V)

    return logits, (h_n[:, :B], c_n[:, :B])


# --------------------------------------------------------------------------
# Pure-JAX reference (mirrors PyTorch semantics) for a numerical self-check.
# --------------------------------------------------------------------------
def lstm2_reference(token_ids, params):
    x = jnp.take(params["embedding"], token_ids, axis=0)              # (B, T, E)
    B, T = token_ids.shape
    H = params["w_hh_l0"].shape[1]

    def cell(xt, h, c, wih, whh, bih, bhh):
        g = xt @ wih.T + bih + h @ whh.T + bhh
        i, f, gg, o = jnp.split(g, 4, axis=-1)
        c = jax.nn.sigmoid(f) * c + jax.nn.sigmoid(i) * jnp.tanh(gg)
        h = jax.nn.sigmoid(o) * jnp.tanh(c)
        return h, c

    def scan_fn(carry, xt):
        h1, c1, h2, c2 = carry
        h1, c1 = cell(xt, h1, c1, params["w_ih_l0"], params["w_hh_l0"],
                      params["b_ih_l0"], params["b_hh_l0"])
        h2, c2 = cell(h1, h2, c2, params["w_ih_l1"], params["w_hh_l1"],
                      params["b_ih_l1"], params["b_hh_l1"])
        return (h1, c1, h2, c2), h2

    z = jnp.zeros((B, H), jnp.float32)
    (h1, c1, h2, c2), h2seq = lax.scan(scan_fn, (z, z, z, z),
                                       jnp.transpose(x, (1, 0, 2)))
    logits = jnp.transpose(h2seq, (1, 0, 2)) @ params["fc_w"].T + params["fc_b"]
    return logits, (jnp.stack([h1, h2]), jnp.stack([c1, c2]))


def init_params(key, vocab_size, embedding_dim, hidden_dim):
    ks = jax.random.split(key, 11)
    s = 0.1
    return {
        "embedding": jax.random.normal(ks[0], (vocab_size, embedding_dim), jnp.float32) * s,
        "w_ih_l0": jax.random.normal(ks[1], (4 * hidden_dim, embedding_dim), jnp.float32) * s,
        "w_hh_l0": jax.random.normal(ks[2], (4 * hidden_dim, hidden_dim), jnp.float32) * s,
        "b_ih_l0": jax.random.normal(ks[3], (4 * hidden_dim,), jnp.float32) * s,
        "b_hh_l0": jax.random.normal(ks[4], (4 * hidden_dim,), jnp.float32) * s,
        "w_ih_l1": jax.random.normal(ks[5], (4 * hidden_dim, hidden_dim), jnp.float32) * s,
        "w_hh_l1": jax.random.normal(ks[6], (4 * hidden_dim, hidden_dim), jnp.float32) * s,
        "b_ih_l1": jax.random.normal(ks[7], (4 * hidden_dim,), jnp.float32) * s,
        "b_hh_l1": jax.random.normal(ks[8], (4 * hidden_dim,), jnp.float32) * s,
        "fc_w": jax.random.normal(ks[9], (vocab_size, hidden_dim), jnp.float32) * s,
        "fc_b": jax.random.normal(ks[10], (vocab_size,), jnp.float32) * s,
    }


if __name__ == "__main__":
    vocab_size = 50
    embedding_dim = 16
    hidden_dim = 32
    batch = 2
    seq = 8

    key = jax.random.PRNGKey(0)
    k_param, k_tok = jax.random.split(key)
    params = init_params(k_param, vocab_size, embedding_dim, hidden_dim)
    token_ids = jax.random.randint(k_tok, (batch, seq), 0, vocab_size, dtype=jnp.int32)

    fwd = jax.jit(functools.partial(lstm2_forward, params=params))
    logits, (h_n, c_n) = fwd(token_ids)
    jax.block_until_ready((logits, h_n, c_n))

    assert logits.shape == (batch, seq, vocab_size)
    assert h_n.shape == (2, batch, hidden_dim)
    assert c_n.shape == (2, batch, hidden_dim)

    # Numerical self-check against the pure-JAX reference.
    ref_logits, (ref_h, ref_c) = jax.jit(
        functools.partial(lstm2_reference, params=params))(token_ids)
    jax.block_until_ready((ref_logits, ref_h, ref_c))
    assert jnp.allclose(logits, ref_logits, atol=5e-3, rtol=5e-3)
    assert jnp.allclose(h_n, ref_h, atol=5e-3, rtol=5e-3)
    assert jnp.allclose(c_n, ref_c, atol=5e-3, rtol=5e-3)

    print("KERNEL_OK")
</pallas_src>

<mosaic_0001>
module attributes {stable_mosaic.version = 11 : i64} {
  func.func @_lstm2_recurrence_kernel(%arg0: i32, %arg1: memref<8x8x128xf32, #tpu.memory_space<vmem>>, %arg2: memref<32x128xf32, #tpu.memory_space<vmem>>, %arg3: memref<64x128xf32, #tpu.memory_space<vmem>>, %arg4: memref<1x128xf32, #tpu.memory_space<vmem>>, %arg5: memref<8x8x32xf32, #tpu.memory_space<vmem>>, %arg6: memref<2x8x32xf32, #tpu.memory_space<vmem>>, %arg7: memref<2x8x32xf32, #tpu.memory_space<vmem>>, %arg8: memref<2x8x32xf32, #tpu.memory_space<vmem>>, %arg9: memref<2x8x32xf32, #tpu.memory_space<vmem>>) attributes {dimension_semantics = [#tpu.dimension_semantics<arbitrary>], iteration_bounds = array<i64: 1>, scalar_prefetch = 0 : i64, scratch_operands = 2 : i64, tpu.core_type = #tpu.core_type<tc>, window_params = [{transform_indices = @transform_0, window_bounds = array<i64: 8, 8, 128>}, {pipeline_mode = #tpu.pipeline_mode<synchronous>, transform_indices = @transform_1, window_bounds = array<i64: 32, 128>}, {pipeline_mode = #tpu.pipeline_mode<synchronous>, transform_indices = @transform_2, window_bounds = array<i64: 64, 128>}, {pipeline_mode = #tpu.pipeline_mode<synchronous>, transform_indices = @transform_3, window_bounds = array<i64: 1, 128>}, {transform_indices = @transform_4, window_bounds = array<i64: 8, 8, 32>}, {pipeline_mode = #tpu.pipeline_mode<synchronous>, transform_indices = @transform_5, window_bounds = array<i64: 2, 8, 32>}, {pipeline_mode = #tpu.pipeline_mode<synchronous>, transform_indices = @transform_6, window_bounds = array<i64: 2, 8, 32>}]} {
    %c0_i32 = arith.constant 0 : i32
    %0 = arith.cmpi eq, %arg0, %c0_i32 : i32
    %1 = arith.extui %0 : i1 to i32
    %c0_i32_0 = arith.constant 0 : i32
    %2 = arith.cmpi ne, %1, %c0_i32_0 : i32
    scf.if %2 {
      %cst_127 = arith.constant 0.000000e+00 : f32
      %533 = vector.broadcast %cst_127 : f32 to vector<2x8x32xf32>
      %c0_128 = arith.constant 0 : index
      %c0_129 = arith.constant 0 : index
      %c0_130 = arith.constant 0 : index
      %534 = vector.load %arg8[%c0_128, %c0_129, %c0_130] : memref<2x8x32xf32, #tpu.memory_space<vmem>>, vector<2x8x32xf32>
      tpu.vector_store %arg8[%c0_128, %c0_129, %c0_130], %533 {strides = array<i32>} : memref<2x8x32xf32, #tpu.memory_space<vmem>>, vector<2x8x32xf32>,
      %cst_131 = arith.constant 0.000000e+00 : f32
      %535 = vector.broadcast %cst_131 : f32 to vector<2x8x32xf32>
      %c0_132 = arith.constant 0 : index
      %c0_133 = arith.constant 0 : index
      %c0_134 = arith.constant 0 : index
      %536 = vector.load %arg9[%c0_132, %c0_133, %c0_134] : memref<2x8x32xf32, #tpu.memory_space<vmem>>, vector<2x8x32xf32>
      tpu.vector_store %arg9[%c0_132, %c0_133, %c0_134], %535 {strides = array<i32>} : memref<2x8x32xf32, #tpu.memory_space<vmem>>, vector<2x8x32xf32>,
    } else {
    }
    %c0 = arith.constant 0 : index
    %c0_1 = arith.constant 0 : index
    %3 = vector.load %arg2[%c0, %c0_1] : memref<32x128xf32, #tpu.memory_space<vmem>>, vector<32x128xf32>
    %c0_2 = arith.constant 0 : index
    %c0_3 = arith.constant 0 : index
    %4 = vector.load %arg3[%c0_2, %c0_3] : memref<64x128xf32, #tpu.memory_space<vmem>>, vector<64x128xf32>
    %c0_4 = arith.constant 0 : index
    %c0_5 = arith.constant 0 : index
    %5 = vector.load %arg4[%c0_4, %c0_5] : memref<1x128xf32, #tpu.memory_space<vmem>>, vector<1x128xf32>
    %c0_6 = arith.constant 0 : index
    %c0_7 = arith.constant 0 : index
    %c0_8 = arith.constant 0 : index
    %6 = vector.load %arg8[%c0_6, %c0_7, %c0_8] : memref<2x8x32xf32, #tpu.memory_space<vmem>>, vector<1x8x32xf32>
    %7 = vector.shape_cast %6 : vector<1x8x32xf32> to vector<8x32xf32>
    %c0_9 = arith.constant 0 : index
    %c0_10 = arith.constant 0 : index
    %c0_11 = arith.constant 0 : index
    %8 = vector.load %arg9[%c0_9, %c0_10, %c0_11] : memref<2x8x32xf32, #tpu.memory_space<vmem>>, vector<1x8x32xf32>
    %9 = vector.shape_cast %8 : vector<1x8x32xf32> to vector<8x32xf32>
    %c1 = arith.constant 1 : index
    %c0_12 = arith.constant 0 : index
    %c0_13 = arith.constant 0 : index
    %10 = vector.load %arg8[%c1, %c0_12, %c0_13] : memref<2x8x32xf32, #tpu.memory_space<vmem>>, vector<1x8x32xf32>
    %11 = vector.shape_cast %10 : vector<1x8x32xf32> to vector<8x32xf32>
    %c1_14 = arith.constant 1 : index
    %c0_15 = arith.constant 0 : index
    %c0_16 = arith.constant 0 : index
    %12 = vector.load %arg9[%c1_14, %c0_15, %c0_16] : memref<2x8x32xf32, #tpu.memory_space<vmem>>, vector<1x8x32xf32>
    %13 = vector.shape_cast %12 : vector<1x8x32xf32> to vector<8x32xf32>
    %c0_i32_17 = arith.constant 0 : i32
    %14 = arith.index_cast %c0_i32_17 : i32 to index
    %c0_18 = arith.constant 0 : index
    %c0_19 = arith.constant 0 : index
    %15 = vector.load %arg1[%14, %c0_18, %c0_19] : memref<8x8x128xf32, #tpu.memory_space<vmem>>, vector<1x8x128xf32>
    %16 = vector.shape_cast %15 : vector<1x8x128xf32> to vector<8x128xf32>
    %cst = arith.constant dense<0.000000e+00> : vector<8x128xf32>
    %17 = tpu.matmul %7, %3, %cst {dimension_numbers = #tpu.dot_dimension_numbers<[1], [0], [0], [1], [0, 0, 1, 1], [], []>} : vector<8x32xf32>, vector<32x128xf32>, vector<8x128xf32> -> vector<8x128xf32>
    %18 = arith.addf %16, %17 : vector<8x128xf32>
    %19 = vector.extract_strided_slice %18 {offsets = [0, 0], sizes = [8, 32], strides = [1, 1]} : vector<8x128xf32> to vector<8x32xf32>
    %20 = vector.extract_strided_slice %18 {offsets = [0, 32], sizes = [8, 32], strides = [1, 1]} : vector<8x128xf32> to vector<8x32xf32>
    %21 = vector.extract_strided_slice %18 {offsets = [0, 64], sizes = [8, 32], strides = [1, 1]} : vector<8x128xf32> to vector<8x32xf32>
    %22 = vector.extract_strided_slice %18 {offsets = [0, 96], sizes = [8, 32], strides = [1, 1]} : vector<8x128xf32> to vector<8x32xf32>
    %23 = arith.negf %20 : vector<8x32xf32>
    %24 = math.exp %23 : vector<8x32xf32>
    %cst_20 = arith.constant 1.000000e+00 : f32
    %25 = vector.broadcast %cst_20 : f32 to vector<8x32xf32>
    %26 = arith.addf %25, %24 : vector<8x32xf32>
    %27 = arith.divf %25, %26 : vector<8x32xf32>
    %28 = arith.mulf %27, %9 : vector<8x32xf32>
    %29 = arith.negf %19 : vector<8x32xf32>
    %30 = math.exp %29 : vector<8x32xf32>
    %cst_21 = arith.constant 1.000000e+00 : f32
    %31 = vector.broadcast %cst_21 : f32 to vector<8x32xf32>
    %32 = arith.addf %31, %30 : vector<8x32xf32>
    %33 = arith.divf %31, %32 : vector<8x32xf32>
    %34 = math.tanh %21 : vector<8x32xf32>
    %35 = arith.mulf %33, %34 : vector<8x32xf32>
    %36 = arith.addf %28, %35 : vector<8x32xf32>
    %37 = arith.negf %22 : vector<8x32xf32>
    %38 = math.exp %37 : vector<8x32xf32>
    %cst_22 = arith.constant 1.000000e+00 : f32
    %39 = vector.broadcast %cst_22 : f32 to vector<8x32xf32>
    %40 = arith.addf %39, %38 : vector<8x32xf32>
    %41 = arith.divf %39, %40 : vector<8x32xf32>
    %42 = math.tanh %36 : vector<8x32xf32>
    %43 = arith.mulf %41, %42 : vector<8x32xf32>
    %44 = tpu.concatenate %43, %11 in 1 : vector<8x32xf32>, vector<8x32xf32> -> vector<8x64xf32>
    %cst_23 = arith.constant dense<0.000000e+00> : vector<8x128xf32>
    %45 = tpu.matmul %44, %4, %cst_23 {dimension_numbers = #tpu.dot_dimension_numbers<[1], [0], [0], [1], [0, 0, 1, 1], [], []>} : vector<8x64xf32>, vector<64x128xf32>, vector<8x128xf32> -> vector<8x128xf32>
    %46 = vector.broadcast %5 : vector<1x128xf32> to vector<8x128xf32>
    %47 = arith.addf %45, %46 : vector<8x128xf32>
    %48 = vector.extract_strided_slice %47 {offsets = [0, 0], sizes = [8, 32], strides = [1, 1]} : vector<8x128xf32> to vector<8x32xf32>
    %49 = vector.extract_strided_slice %47 {offsets = [0, 32], sizes = [8, 32], strides = [1, 1]} : vector<8x128xf32> to vector<8x32xf32>
    %50 = vector.extract_strided_slice %47 {offsets = [0, 64], sizes = [8, 32], strides = [1, 1]} : vector<8x128xf32> to vector<8x32xf32>
    %51 = vector.extract_strided_slice %47 {offsets = [0, 96], sizes = [8, 32], strides = [1, 1]} : vector<8x128xf32> to vector<8x32xf32>
    %52 = arith.negf %49 : vector<8x32xf32>
    %53 = math.exp %52 : vector<8x32xf32>
    %cst_24 = arith.constant 1.000000e+00 : f32
    %54 = vector.broadcast %cst_24 : f32 to vector<8x32xf32>
    %55 = arith.addf %54, %53 : vector<8x32xf32>
    %56 = arith.divf %54, %55 : vector<8x32xf32>
    %57 = arith.mulf %56, %13 : vector<8x32xf32>
    %58 = arith.negf %48 : vector<8x32xf32>
    %59 = math.exp %58 : vector<8x32xf32>
    %cst_25 = arith.constant 1.000000e+00 : f32
    %60 = vector.broadcast %cst_25 : f32 to vector<8x32xf32>
    %61 = arith.addf %60, %59 : vector<8x32xf32>
    %62 = arith.divf %60, %61 : vector<8x32xf32>
    %63 = math.tanh %50 : vector<8x32xf32>
    %64 = arith.mulf %62, %63 : vector<8x32xf32>
    %65 = arith.addf %57, %64 : vector<8x32xf32>
    %66 = arith.negf %51 : vector<8x32xf32>
    %67 = math.exp %66 : vector<8x32xf32>
    %cst_26 = arith.constant 1.000000e+00 : f32
    %68 = vector.broadcast %cst_26 : f32 to vector<8x32xf32>
    %69 = arith.addf %68, %67 : vector<8x32xf32>
    %70 = arith.divf %68, %69 : vector<8x32xf32>
    %71 = math.tanh %65 : vector<8x32xf32>
    %72 = arith.mulf %70, %71 : vector<8x32xf32>
    %73 = arith.index_cast %c0_i32_17 : i32 to index
    %c0_27 = arith.constant 0 : index
    %c0_28 = arith.constant 0 : index
    %74 = vector.load %arg5[%73, %c0_27, %c0_28] : memref<8x8x32xf32, #tpu.memory_space<vmem>>, vector<1x8x32xf32>
    %75 = vector.shape_cast %74 : vector<1x8x32xf32> to vector<8x32xf32>
    %76 = vector.shape_cast %72 : vector<8x32xf32> to vector<1x8x32xf32>
    tpu.vector_store %arg5[%73, %c0_27, %c0_28], %76 {strides = array<i32>} : memref<8x8x32xf32, #tpu.memory_space<vmem>>, vector<1x8x32xf32>,
    %c1_i32 = arith.constant 1 : i32
    %77 = arith.index_cast %c1_i32 : i32 to index
    %c0_29 = arith.constant 0 : index
    %c0_30 = arith.constant 0 : index
    %78 = vector.load %arg1[%77, %c0_29, %c0_30] : memref<8x8x128xf32, #tpu.memory_space<vmem>>, vector<1x8x128xf32>
    %79 = vector.shape_cast %78 : vector<1x8x128xf32> to vector<8x128xf32>
    %cst_31 = arith.constant dense<0.000000e+00> : vector<8x128xf32>
    %80 = tpu.matmul %43, %3, %cst_31 {dimension_numbers = #tpu.dot_dimension_numbers<[1], [0], [0], [1], [0, 0, 1, 1], [], []>} : vector<8x32xf32>, vector<32x128xf32>, vector<8x128xf32> -> vector<8x128xf32>
    %81 = arith.addf %79, %80 : vector<8x128xf32>
    %82 = vector.extract_strided_slice %81 {offsets = [0, 0], sizes = [8, 32], strides = [1, 1]} : vector<8x128xf32> to vector<8x32xf32>
    %83 = vector.extract_strided_slice %81 {offsets = [0, 32], sizes = [8, 32], strides = [1, 1]} : vector<8x128xf32> to vector<8x32xf32>
    %84 = vector.extract_strided_slice %81 {offsets = [0, 64], sizes = [8, 32], strides = [1, 1]} : vector<8x128xf32> to vector<8x32xf32>
    %85 = vector.extract_strided_slice %81 {offsets = [0, 96], sizes = [8, 32], strides = [1, 1]} : vector<8x128xf32> to vector<8x32xf32>
    %86 = arith.negf %83 : vector<8x32xf32>
    %87 = math.exp %86 : vector<8x32xf32>
    %cst_32 = arith.constant 1.000000e+00 : f32
    %88 = vector.broadcast %cst_32 : f32 to vector<8x32xf32>
    %89 = arith.addf %88, %87 : vector<8x32xf32>
    %90 = arith.divf %88, %89 : vector<8x32xf32>
    %91 = arith.mulf %90, %36 : vector<8x32xf32>
    %92 = arith.negf %82 : vector<8x32xf32>
    %93 = math.exp %92 : vector<8x32xf32>
    %cst_33 = arith.constant 1.000000e+00 : f32
    %94 = vector.broadcast %cst_33 : f32 to vector<8x32xf32>
    %95 = arith.addf %94, %93 : vector<8x32xf32>
    %96 = arith.divf %94, %95 : vector<8x32xf32>
    %97 = math.tanh %84 : vector<8x32xf32>
    %98 = arith.mulf %96, %97 : vector<8x32xf32>
    %99 = arith.addf %91, %98 : vector<8x32xf32>
    %100 = arith.negf %85 : vector<8x32xf32>
    %101 = math.exp %100 : vector<8x32xf32>
    %cst_34 = arith.constant 1.000000e+00 : f32
    %102 = vector.broadcast %cst_34 : f32 to vector<8x32xf32>
    %103 = arith.addf %102, %101 : vector<8x32xf32>
    %104 = arith.divf %102, %103 : vector<8x32xf32>
    %105 = math.tanh %99 : vector<8x32xf32>
    %106 = arith.mulf %104, %105 : vector<8x32xf32>
    %107 = tpu.concatenate %106, %72 in 1 : vector<8x32xf32>, vector<8x32xf32> -> vector<8x64xf32>
    %cst_35 = arith.constant dense<0.000000e+00> : vector<8x128xf32>
    %108 = tpu.matmul %107, %4, %cst_35 {dimension_numbers = #tpu.dot_dimension_numbers<[1], [0], [0], [1], [0, 0, 1, 1], [], []>} : vector<8x64xf32>, vector<64x128xf32>, vector<8x128xf32> -> vector<8x128xf32>
    %109 = vector.broadcast %5 : vector<1x128xf32> to vector<8x128xf32>
    %110 = arith.addf %108, %109 : vector<8x128xf32>
    %111 = vector.extract_strided_slice %110 {offsets = [0, 0], sizes = [8, 32], strides = [1, 1]} : vector<8x128xf32> to vector<8x32xf32>
    %112 = vector.extract_strided_slice %110 {offsets = [0, 32], sizes = [8, 32], strides = [1, 1]} : vector<8x128xf32> to vector<8x32xf32>
    %113 = vector.extract_strided_slice %110 {offsets = [0, 64], sizes = [8, 32], strides = [1, 1]} : vector<8x128xf32> to vector<8x32xf32>
    %114 = vector.extract_strided_slice %110 {offsets = [0, 96], sizes = [8, 32], strides = [1, 1]} : vector<8x128xf32> to vector<8x32xf32>
    %115 = arith.negf %112 : vector<8x32xf32>
    %116 = math.exp %115 : vector<8x32xf32>
    %cst_36 = arith.constant 1.000000e+00 : f32
    %117 = vector.broadcast %cst_36 : f32 to vector<8x32xf32>
    %118 = arith.addf %117, %116 : vector<8x32xf32>
    %119 = arith.divf %117, %118 : vector<8x32xf32>
    %120 = arith.mulf %119, %65 : vector<8x32xf32>
    %121 = arith.negf %111 : vector<8x32xf32>
    %122 = math.exp %121 : vector<8x32xf32>
    %cst_37 = arith.constant 1.000000e+00 : f32
    %123 = vector.broadcast %cst_37 : f32 to vector<8x32xf32>
    %124 = arith.addf %123, %122 : vector<8x32xf32>
    %125 = arith.divf %123, %124 : vector<8x32xf32>
    %126 = math.tanh %113 : vector<8x32xf32>
    %127 = arith.mulf %125, %126 : vector<8x32xf32>
    %128 = arith.addf %120, %127 : vector<8x32xf32>
    %129 = arith.negf %114 : vector<8x32xf32>
    %130 = math.exp %129 : vector<8x32xf32>
    %cst_38 = arith.constant 1.000000e+00 : f32
    %131 = vector.broadcast %cst_38 : f32 to vector<8x32xf32>
    %132 = arith.addf %131, %130 : vector<8x32xf32>
    %133 = arith.divf %131, %132 : vector<8x32xf32>
    %134 = math.tanh %128 : vector<8x32xf32>
    %135 = arith.mulf %133, %134 : vector<8x32xf32>
    %136 = arith.index_cast %c1_i32 : i32 to index
    %c0_39 = arith.constant 0 : index
    %c0_40 = arith.constant 0 : index
    %137 = vector.load %arg5[%136, %c0_39, %c0_40] : memref<8x8x32xf32, #tpu.memory_space<vmem>>, vector<1x8x32xf32>
    %138 = vector.shape_cast %137 : vector<1x8x32xf32> to vector<8x32xf32>
    %139 = vector.shape_cast %135 : vector<8x32xf32> to vector<1x8x32xf32>
    tpu.vector_store %arg5[%136, %c0_39, %c0_40], %139 {strides = array<i32>} : memref<8x8x32xf32, #tpu.memory_space<vmem>>, vector<1x8x32xf32>,
    %c2_i32 = arith.constant 2 : i32
    %140 = arith.index_cast %c2_i32 : i32 to index
    %c0_41 = arith.constant 0 : index
    %c0_42 = arith.constant 0 : index
    %141 = vector.load %arg1[%140, %c0_41, %c0_42] : memref<8x8x128xf32, #tpu.memory_space<vmem>>, vector<1x8x128xf32>
    %142 = vector.shape_cast %141 : vector<1x8x128xf32> to vector<8x128xf32>
    %cst_43 = arith.constant dense<0.000000e+00> : vector<8x128xf32>
    %143 = tpu.matmul %106, %3, %cst_43 {dimension_numbers = #tpu.dot_dimension_numbers<[1], [0], [0], [1], [0, 0, 1, 1], [], []>} : vector<8x32xf32>, vector<32x128xf32>, vector<8x128xf32> -> vector<8x128xf32>
    %144 = arith.addf %142, %143 : vector<8x128xf32>
    %145 = vector.extract_strided_slice %144 {offsets = [0, 0], sizes = [8, 32], strides = [1, 1]} : vector<8x128xf32> to vector<8x32xf32>
    %146 = vector.extract_strided_slice %144 {offsets = [0, 32], sizes = [8, 32], strides = [1, 1]} : vector<8x128xf32> to vector<8x32xf32>
    %147 = vector.extract_strided_slice %144 {offsets = [0, 64], sizes = [8, 32], strides = [1, 1]} : vector<8x128xf32> to vector<8x32xf32>
    %148 = vector.extract_strided_slice %144 {offsets = [0, 96], sizes = [8, 32], strides = [1, 1]} : vector<8x128xf32> to vector<8x32xf32>
    %149 = arith.negf %146 : vector<8x32xf32>
    %150 = math.exp %149 : vector<8x32xf32>
    %cst_44 = arith.constant 1.000000e+00 : f32
    %151 = vector.broadcast %cst_44 : f32 to vector<8x32xf32>
    %152 = arith.addf %151, %150 : vector<8x32xf32>
    %153 = arith.divf %151, %152 : vector<8x32xf32>
    %154 = arith.mulf %153, %99 : vector<8x32xf32>
    %155 = arith.negf %145 : vector<8x32xf32>
    %156 = math.exp %155 : vector<8x32xf32>
    %cst_45 = arith.constant 1.000000e+00 : f32
    %157 = vector.broadcast %cst_45 : f32 to vector<8x32xf32>
    %158 = arith.addf %157, %156 : vector<8x32xf32>
    %159 = arith.divf %157, %158 : vector<8x32xf32>
    %160 = math.tanh %147 : vector<8x32xf32>
    %161 = arith.mulf %159, %160 : vector<8x32xf32>
    %162 = arith.addf %154, %161 : vector<8x32xf32>
    %163 = arith.negf %148 : vector<8x32xf32>
    %164 = math.exp %163 : vector<8x32xf32>
    %cst_46 = arith.constant 1.000000e+00 : f32
    %165 = vector.broadcast %cst_46 : f32 to vector<8x32xf32>
    %166 = arith.addf %165, %164 : vector<8x32xf32>
    %167 = arith.divf %165, %166 : vector<8x32xf32>
    %168 = math.tanh %162 : vector<8x32xf32>
    %169 = arith.mulf %167, %168 : vector<8x32xf32>
    %170 = tpu.concatenate %169, %135 in 1 : vector<8x32xf32>, vector<8x32xf32> -> vector<8x64xf32>
    %cst_47 = arith.constant dense<0.000000e+00> : vector<8x128xf32>
    %171 = tpu.matmul %170, %4, %cst_47 {dimension_numbers = #tpu.dot_dimension_numbers<[1], [0], [0], [1], [0, 0, 1, 1], [], []>} : vector<8x64xf32>, vector<64x128xf32>, vector<8x128xf32> -> vector<8x128xf32>
    %172 = vector.broadcast %5 : vector<1x128xf32> to vector<8x128xf32>
    %173 = arith.addf %171, %172 : vector<8x128xf32>
    %174 = vector.extract_strided_slice %173 {offsets = [0, 0], sizes = [8, 32], strides = [1, 1]} : vector<8x128xf32> to vector<8x32xf32>
    %175 = vector.extract_strided_slice %173 {offsets = [0, 32], sizes = [8, 32], strides = [1, 1]} : vector<8x128xf32> to vector<8x32xf32>
    %176 = vector.extract_strided_slice %173 {offsets = [0, 64], sizes = [8, 32], strides = [1, 1]} : vector<8x128xf32> to vector<8x32xf32>
    %177 = vector.extract_strided_slice %173 {offsets = [0, 96], sizes = [8, 32], strides = [1, 1]} : vector<8x128xf32> to vector<8x32xf32>
    %178 = arith.negf %175 : vector<8x32xf32>
    %179 = math.exp %178 : vector<8x32xf32>
    %cst_48 = arith.constant 1.000000e+00 : f32
    %180 = vector.broadcast %cst_48 : f32 to vector<8x32xf32>
    %181 = arith.addf %180, %179 : vector<8x32xf32>
    %182 = arith.divf %180, %181 : vector<8x32xf32>
    %183 = arith.mulf %182, %128 : vector<8x32xf32>
    %184 = arith.negf %174 : vector<8x32xf32>
    %185 = math.exp %184 : vector<8x32xf32>
    %cst_49 = arith.constant 1.000000e+00 : f32
    %186 = vector.broadcast %cst_49 : f32 to vector<8x32xf32>
    %187 = arith.addf %186, %185 : vector<8x32xf32>
    %188 = arith.divf %186, %187 : vector<8x32xf32>
    %189 = math.tanh %176 : vector<8x32xf32>
    %190 = arith.mulf %188, %189 : vector<8x32xf32>
    %191 = arith.addf %183, %190 : vector<8x32xf32>
    %192 = arith.negf %177 : vector<8x32xf32>
    %193 = math.exp %192 : vector<8x32xf32>
    %cst_50 = arith.constant 1.000000e+00 : f32
    %194 = vector.broadcast %cst_50 : f32 to vector<8x32xf32>
    %195 = arith.addf %194, %193 : vector<8x32xf32>
    %196 = arith.divf %194, %195 : vector<8x32xf32>
    %197 = math.tanh %191 : vector<8x32xf32>
    %198 = arith.mulf %196, %197 : vector<8x32xf32>
    %199 = arith.index_cast %c2_i32 : i32 to index
    %c0_51 = arith.constant 0 : index
    %c0_52 = arith.constant 0 : index
    %200 = vector.load %arg5[%199, %c0_51, %c0_52] : memref<8x8x32xf32, #tpu.memory_space<vmem>>, vector<1x8x32xf32>
    %201 = vector.shape_cast %200 : vector<1x8x32xf32> to vector<8x32xf32>
    %202 = vector.shape_cast %198 : vector<8x32xf32> to vector<1x8x32xf32>
    tpu.vector_store %arg5[%199, %c0_51, %c0_52], %202 {strides = array<i32>} : memref<8x8x32xf32, #tpu.memory_space<vmem>>, vector<1x8x32xf32>,
    %c3_i32 = arith.constant 3 : i32
    %203 = arith.index_cast %c3_i32 : i32 to index
    %c0_53 = arith.constant 0 : index
    %c0_54 = arith.constant 0 : index
    %204 = vector.load %arg1[%203, %c0_53, %c0_54] : memref<8x8x128xf32, #tpu.memory_space<vmem>>, vector<1x8x128xf32>
    %205 = vector.shape_cast %204 : vector<1x8x128xf32> to vector<8x128xf32>
    %cst_55 = arith.constant dense<0.000000e+00> : vector<8x128xf32>
    %206 = tpu.matmul %169, %3, %cst_55 {dimension_numbers = #tpu.dot_dimension_numbers<[1], [0], [0], [1], [0, 0, 1, 1], [], []>} : vector<8x32xf32>, vector<32x128xf32>, vector<8x128xf32> -> vector<8x128xf32>
    %207 = arith.addf %205, %206 : vector<8x128xf32>
    %208 = vector.extract_strided_slice %207 {offsets = [0, 0], sizes = [8, 32], strides = [1, 1]} : vector<8x128xf32> to vector<8x32xf32>
    %209 = vector.extract_strided_slice %207 {offsets = [0, 32], sizes = [8, 32], strides = [1, 1]} : vector<8x128xf32> to vector<8x32xf32>
    %210 = vector.extract_strided_slice %207 {offsets = [0, 64], sizes = [8, 32], strides = [1, 1]} : vector<8x128xf32> to vector<8x32xf32>
    %211 = vector.extract_strided_slice %207 {offsets = [0, 96], sizes = [8, 32], strides = [1, 1]} : vector<8x128xf32> to vector<8x32xf32>
    %212 = arith.negf %209 : vector<8x32xf32>
    %213 = math.exp %212 : vector<8x32xf32>
    %cst_56 = arith.constant 1.000000e+00 : f32
    %214 = vector.broadcast %cst_56 : f32 to vector<8x32xf32>
    %215 = arith.addf %214, %213 : vector<8x32xf32>
    %216 = arith.divf %214, %215 : vector<8x32xf32>
    %217 = arith.mulf %216, %162 : vector<8x32xf32>
    %218 = arith.negf %208 : vector<8x32xf32>
    %219 = math.exp %218 : vector<8x32xf32>
    %cst_57 = arith.constant 1.000000e+00 : f32
    %220 = vector.broadcast %cst_57 : f32 to vector<8x32xf32>
    %221 = arith.addf %220, %219 : vector<8x32xf32>
    %222 = arith.divf %220, %221 : vector<8x32xf32>
    %223 = math.tanh %210 : vector<8x32xf32>
    %224 = arith.mulf %222, %223 : vector<8x32xf32>
    %225 = arith.addf %217, %224 : vector<8x32xf32>
    %226 = arith.negf %211 : vector<8x32xf32>
    %227 = math.exp %226 : vector<8x32xf32>
    %cst_58 = arith.constant 1.000000e+00 : f32
    %228 = vector.broadcast %cst_58 : f32 to vector<8x32xf32>
    %229 = arith.addf %228, %227 : vector<8x32xf32>
    %230 = arith.divf %228, %229 : vector<8x32xf32>
    %231 = math.tanh %225 : vector<8x32xf32>
    %232 = arith.mulf %230, %231 : vector<8x32xf32>
    %233 = tpu.concatenate %232, %198 in 1 : vector<8x32xf32>, vector<8x32xf32> -> vector<8x64xf32>
    %cst_59 = arith.constant dense<0.000000e+00> : vector<8x128xf32>
    %234 = tpu.matmul %233, %4, %cst_59 {dimension_numbers = #tpu.dot_dimension_numbers<[1], [0], [0], [1], [0, 0, 1, 1], [], []>} : vector<8x64xf32>, vector<64x128xf32>, vector<8x128xf32> -> vector<8x128xf32>
    %235 = vector.broadcast %5 : vector<1x128xf32> to vector<8x128xf32>
    %236 = arith.addf %234, %235 : vector<8x128xf32>
    %237 = vector.extract_strided_slice %236 {offsets = [0, 0], sizes = [8, 32], strides = [1, 1]} : vector<8x128xf32> to vector<8x32xf32>
    %238 = vector.extract_strided_slice %236 {offsets = [0, 32], sizes = [8, 32], strides = [1, 1]} : vector<8x128xf32> to vector<8x32xf32>
    %239 = vector.extract_strided_slice %236 {offsets = [0, 64], sizes = [8, 32], strides = [1, 1]} : vector<8x128xf32> to vector<8x32xf32>
    %240 = vector.extract_strided_slice %236 {offsets = [0, 96], sizes = [8, 32], strides = [1, 1]} : vector<8x128xf32> to vector<8x32xf32>
    %241 = arith.negf %238 : vector<8x32xf32>
    %242 = math.exp %241 : vector<8x32xf32>
    %cst_60 = arith.constant 1.000000e+00 : f32
    %243 = vector.broadcast %cst_60 : f32 to vector<8x32xf32>
    %244 = arith.addf %243, %242 : vector<8x32xf32>
    %245 = arith.divf %243, %244 : vector<8x32xf32>
    %246 = arith.mulf %245, %191 : vector<8x32xf32>
    %247 = arith.negf %237 : vector<8x32xf32>
    %248 = math.exp %247 : vector<8x32xf32>
    %cst_61 = arith.constant 1.000000e+00 : f32
    %249 = vector.broadcast %cst_61 : f32 to vector<8x32xf32>
    %250 = arith.addf %249, %248 : vector<8x32xf32>
    %251 = arith.divf %249, %250 : vector<8x32xf32>
    %252 = math.tanh %239 : vector<8x32xf32>
    %253 = arith.mulf %251, %252 : vector<8x32xf32>
    %254 = arith.addf %246, %253 : vector<8x32xf32>
    %255 = arith.negf %240 : vector<8x32xf32>
    %256 = math.exp %255 : vector<8x32xf32>
    %cst_62 = arith.constant 1.000000e+00 : f32
    %257 = vector.broadcast %cst_62 : f32 to vector<8x32xf32>
    %258 = arith.addf %257, %256 : vector<8x32xf32>
    %259 = arith.divf %257, %258 : vector<8x32xf32>
    %260 = math.tanh %254 : vector<8x32xf32>
    %261 = arith.mulf %259, %260 : vector<8x32xf32>
    %262 = arith.index_cast %c3_i32 : i32 to index
    %c0_63 = arith.constant 0 : index
    %c0_64 = arith.constant 0 : index
    %263 = vector.load %arg5[%262, %c0_63, %c0_64] : memref<8x8x32xf32, #tpu.memory_space<vmem>>, vector<1x8x32xf32>
    %264 = vector.shape_cast %263 : vector<1x8x32xf32> to vector<8x32xf32>
    %265 = vector.shape_cast %261 : vector<8x32xf32> to vector<1x8x32xf32>
    tpu.vector_store %arg5[%262, %c0_63, %c0_64], %265 {strides = array<i32>} : memref<8x8x32xf32, #tpu.memory_space<vmem>>, vector<1x8x32xf32>,
    %c4_i32 = arith.constant 4 : i32
    %266 = arith.index_cast %c4_i32 : i32 to index
    %c0_65 = arith.constant 0 : index
    %c0_66 = arith.constant 0 : index
    %267 = vector.load %arg1[%266, %c0_65, %c0_66] : memref<8x8x128xf32, #tpu.memory_space<vmem>>, vector<1x8x128xf32>
    %268 = vector.shape_cast %267 : vector<1x8x128xf32> to vector<8x128xf32>
    %cst_67 = arith.constant dense<0.000000e+00> : vector<8x128xf32>
    %269 = tpu.matmul %232, %3, %cst_67 {dimension_numbers = #tpu.dot_dimension_numbers<[1], [0], [0], [1], [0, 0, 1, 1], [], []>} : vector<8x32xf32>, vector<32x128xf32>, vector<8x128xf32> -> vector<8x128xf32>
    %270 = arith.addf %268, %269 : vector<8x128xf32>
    %271 = vector.extract_strided_slice %270 {offsets = [0, 0], sizes = [8, 32], strides = [1, 1]} : vector<8x128xf32> to vector<8x32xf32>
    %272 = vector.extract_strided_slice %270 {offsets = [0, 32], sizes = [8, 32], strides = [1, 1]} : vector<8x128xf32> to vector<8x32xf32>
    %273 = vector.extract_strided_slice %270 {offsets = [0, 64], sizes = [8, 32], strides = [1, 1]} : vector<8x128xf32> to vector<8x32xf32>
    %274 = vector.extract_strided_slice %270 {offsets = [0, 96], sizes = [8, 32], strides = [1, 1]} : vector<8x128xf32> to vector<8x32xf32>
    %275 = arith.negf %272 : vector<8x32xf32>
    %276 = math.exp %275 : vector<8x32xf32>
    %cst_68 = arith.constant 1.000000e+00 : f32
    %277 = vector.broadcast %cst_68 : f32 to vector<8x32xf32>
    %278 = arith.addf %277, %276 : vector<8x32xf32>
    %279 = arith.divf %277, %278 : vector<8x32xf32>
    %280 = arith.mulf %279, %225 : vector<8x32xf32>
    %281 = arith.negf %271 : vector<8x32xf32>
    %282 = math.exp %281 : vector<8x32xf32>
    %cst_69 = arith.constant 1.000000e+00 : f32
    %283 = vector.broadcast %cst_69 : f32 to vector<8x32xf32>
    %284 = arith.addf %283, %282 : vector<8x32xf32>
    %285 = arith.divf %283, %284 : vector<8x32xf32>
    %286 = math.tanh %273 : vector<8x32xf32>
    %287 = arith.mulf %285, %286 : vector<8x32xf32>
    %288 = arith.addf %280, %287 : vector<8x32xf32>
    %289 = arith.negf %274 : vector<8x32xf32>
    %290 = math.exp %289 : vector<8x32xf32>
    %cst_70 = arith.constant 1.000000e+00 : f32
    %291 = vector.broadcast %cst_70 : f32 to vector<8x32xf32>
    %292 = arith.addf %291, %290 : vector<8x32xf32>
    %293 = arith.divf %291, %292 : vector<8x32xf32>
    %294 = math.tanh %288 : vector<8x32xf32>
    %295 = arith.mulf %293, %294 : vector<8x32xf32>
    %296 = tpu.concatenate %295, %261 in 1 : vector<8x32xf32>, vector<8x32xf32> -> vector<8x64xf32>
    %cst_71 = arith.constant dense<0.000000e+00> : vector<8x128xf32>
    %297 = tpu.matmul %296, %4, %cst_71 {dimension_numbers = #tpu.dot_dimension_numbers<[1], [0], [0], [1], [0, 0, 1, 1], [], []>} : vector<8x64xf32>, vector<64x128xf32>, vector<8x128xf32> -> vector<8x128xf32>
    %298 = vector.broadcast %5 : vector<1x128xf32> to vector<8x128xf32>
    %299 = arith.addf %297, %298 : vector<8x128xf32>
    %300 = vector.extract_strided_slice %299 {offsets = [0, 0], sizes = [8, 32], strides = [1, 1]} : vector<8x128xf32> to vector<8x32xf32>
    %301 = vector.extract_strided_slice %299 {offsets = [0, 32], sizes = [8, 32], strides = [1, 1]} : vector<8x128xf32> to vector<8x32xf32>
    %302 = vector.extract_strided_slice %299 {offsets = [0, 64], sizes = [8, 32], strides = [1, 1]} : vector<8x128xf32> to vector<8x32xf32>
    %303 = vector.extract_strided_slice %299 {offsets = [0, 96], sizes = [8, 32], strides = [1, 1]} : vector<8x128xf32> to vector<8x32xf32>
    %304 = arith.negf %301 : vector<8x32xf32>
    %305 = math.exp %304 : vector<8x32xf32>
    %cst_72 = arith.constant 1.000000e+00 : f32
    %306 = vector.broadcast %cst_72 : f32 to vector<8x32xf32>
    %307 = arith.addf %306, %305 : vector<8x32xf32>
    %308 = arith.divf %306, %307 : vector<8x32xf32>
    %309 = arith.mulf %308, %254 : vector<8x32xf32>
    %310 = arith.negf %300 : vector<8x32xf32>
    %311 = math.exp %310 : vector<8x32xf32>
    %cst_73 = arith.constant 1.000000e+00 : f32
    %312 = vector.broadcast %cst_73 : f32 to vector<8x32xf32>
    %313 = arith.addf %312, %311 : vector<8x32xf32>
    %314 = arith.divf %312, %313 : vector<8x32xf32>
    %315 = math.tanh %302 : vector<8x32xf32>
    %316 = arith.mulf %314, %315 : vector<8x32xf32>
    %317 = arith.addf %309, %316 : vector<8x32xf32>
    %318 = arith.negf %303 : vector<8x32xf32>
    %319 = math.exp %318 : vector<8x32xf32>
    %cst_74 = arith.constant 1.000000e+00 : f32
    %320 = vector.broadcast %cst_74 : f32 to vector<8x32xf32>
    %321 = arith.addf %320, %319 : vector<8x32xf32>
    %322 = arith.divf %320, %321 : vector<8x32xf32>
    %323 = math.tanh %317 : vector<8x32xf32>
    %324 = arith.mulf %322, %323 : vector<8x32xf32>
    %325 = arith.index_cast %c4_i32 : i32 to index
    %c0_75 = arith.constant 0 : index
    %c0_76 = arith.constant 0 : index
    %326 = vector.load %arg5[%325, %c0_75, %c0_76] : memref<8x8x32xf32, #tpu.memory_space<vmem>>, vector<1x8x32xf32>
    %327 = vector.shape_cast %326 : vector<1x8x32xf32> to vector<8x32xf32>
    %328 = vector.shape_cast %324 : vector<8x32xf32> to vector<1x8x32xf32>
    tpu.vector_store %arg5[%325, %c0_75, %c0_76], %328 {strides = array<i32>} : memref<8x8x32xf32, #tpu.memory_space<vmem>>, vector<1x8x32xf32>,
    %c5_i32 = arith.constant 5 : i32
    %329 = arith.index_cast %c5_i32 : i32 to index
    %c0_77 = arith.constant 0 : index
    %c0_78 = arith.constant 0 : index
    %330 = vector.load %arg1[%329, %c0_77, %c0_78] : memref<8x8x128xf32, #tpu.memory_space<vmem>>, vector<1x8x128xf32>
    %331 = vector.shape_cast %330 : vector<1x8x128xf32> to vector<8x128xf32>
    %cst_79 = arith.constant dense<0.000000e+00> : vector<8x128xf32>
    %332 = tpu.matmul %295, %3, %cst_79 {dimension_numbers = #tpu.dot_dimension_numbers<[1], [0], [0], [1], [0, 0, 1, 1], [], []>} : vector<8x32xf32>, vector<32x128xf32>, vector<8x128xf32> -> vector<8x128xf32>
    %333 = arith.addf %331, %332 : vector<8x128xf32>
    %334 = vector.extract_strided_slice %333 {offsets = [0, 0], sizes = [8, 32], strides = [1, 1]} : vector<8x128xf32> to vector<8x32xf32>
    %335 = vector.extract_strided_slice %333 {offsets = [0, 32], sizes = [8, 32], strides = [1, 1]} : vector<8x128xf32> to vector<8x32xf32>
    %336 = vector.extract_strided_slice %333 {offsets = [0, 64], sizes = [8, 32], strides = [1, 1]} : vector<8x128xf32> to vector<8x32xf32>
    %337 = vector.extract_strided_slice %333 {offsets = [0, 96], sizes = [8, 32], strides = [1, 1]} : vector<8x128xf32> to vector<8x32xf32>
    %338 = arith.negf %335 : vector<8x32xf32>
    %339 = math.exp %338 : vector<8x32xf32>
    %cst_80 = arith.constant 1.000000e+00 : f32
    %340 = vector.broadcast %cst_80 : f32 to vector<8x32xf32>
    %341 = arith.addf %340, %339 : vector<8x32xf32>
    %342 = arith.divf %340, %341 : vector<8x32xf32>
    %343 = arith.mulf %342, %288 : vector<8x32xf32>
    %344 = arith.negf %334 : vector<8x32xf32>
    %345 = math.exp %344 : vector<8x32xf32>
    %cst_81 = arith.constant 1.000000e+00 : f32
    %346 = vector.broadcast %cst_81 : f32 to vector<8x32xf32>
    %347 = arith.addf %346, %345 : vector<8x32xf32>
    %348 = arith.divf %346, %347 : vector<8x32xf32>
    %349 = math.tanh %336 : vector<8x32xf32>
    %350 = arith.mulf %348, %349 : vector<8x32xf32>
    %351 = arith.addf %343, %350 : vector<8x32xf32>
    %352 = arith.negf %337 : vector<8x32xf32>
    %353 = math.exp %352 : vector<8x32xf32>
    %cst_82 = arith.constant 1.000000e+00 : f32
    %354 = vector.broadcast %cst_82 : f32 to vector<8x32xf32>
    %355 = arith.addf %354, %353 : vector<8x32xf32>
    %356 = arith.divf %354, %355 : vector<8x32xf32>
    %357 = math.tanh %351 : vector<8x32xf32>
    %358 = arith.mulf %356, %357 : vector<8x32xf32>
    %359 = tpu.concatenate %358, %324 in 1 : vector<8x32xf32>, vector<8x32xf32> -> vector<8x64xf32>
    %cst_83 = arith.constant dense<0.000000e+00> : vector<8x128xf32>
    %360 = tpu.matmul %359, %4, %cst_83 {dimension_numbers = #tpu.dot_dimension_numbers<[1], [0], [0], [1], [0, 0, 1, 1], [], []>} : vector<8x64xf32>, vector<64x128xf32>, vector<8x128xf32> -> vector<8x128xf32>
    %361 = vector.broadcast %5 : vector<1x128xf32> to vector<8x128xf32>
    %362 = arith.addf %360, %361 : vector<8x128xf32>
    %363 = vector.extract_strided_slice %362 {offsets = [0, 0], sizes = [8, 32], strides = [1, 1]} : vector<8x128xf32> to vector<8x32xf32>
    %364 = vector.extract_strided_slice %362 {offsets = [0, 32], sizes = [8, 32], strides = [1, 1]} : vector<8x128xf32> to vector<8x32xf32>
    %365 = vector.extract_strided_slice %362 {offsets = [0, 64], sizes = [8, 32], strides = [1, 1]} : vector<8x128xf32> to vector<8x32xf32>
    %366 = vector.extract_strided_slice %362 {offsets = [0, 96], sizes = [8, 32], strides = [1, 1]} : vector<8x128xf32> to vector<8x32xf32>
    %367 = arith.negf %364 : vector<8x32xf32>
    %368 = math.exp %367 : vector<8x32xf32>
    %cst_84 = arith.constant 1.000000e+00 : f32
    %369 = vector.broadcast %cst_84 : f32 to vector<8x32xf32>
    %370 = arith.addf %369, %368 : vector<8x32xf32>
    %371 = arith.divf %369, %370 : vector<8x32xf32>
    %372 = arith.mulf %371, %317 : vector<8x32xf32>
    %373 = arith.negf %363 : vector<8x32xf32>
    %374 = math.exp %373 : vector<8x32xf32>
    %cst_85 = arith.constant 1.000000e+00 : f32
    %375 = vector.broadcast %cst_85 : f32 to vector<8x32xf32>
    %376 = arith.addf %375, %374 : vector<8x32xf32>
    %377 = arith.divf %375, %376 : vector<8x32xf32>
    %378 = math.tanh %365 : vector<8x32xf32>
    %379 = arith.mulf %377, %378 : vector<8x32xf32>
    %380 = arith.addf %372, %379 : vector<8x32xf32>
    %381 = arith.negf %366 : vector<8x32xf32>
    %382 = math.exp %381 : vector<8x32xf32>
    %cst_86 = arith.constant 1.000000e+00 : f32
    %383 = vector.broadcast %cst_86 : f32 to vector<8x32xf32>
    %384 = arith.addf %383, %382 : vector<8x32xf32>
    %385 = arith.divf %383, %384 : vector<8x32xf32>
    %386 = math.tanh %380 : vector<8x32xf32>
    %387 = arith.mulf %385, %386 : vector<8x32xf32>
    %388 = arith.index_cast %c5_i32 : i32 to index
    %c0_87 = arith.constant 0 : index
    %c0_88 = arith.constant 0 : index
    %389 = vector.load %arg5[%388, %c0_87, %c0_88] : memref<8x8x32xf32, #tpu.memory_space<vmem>>, vector<1x8x32xf32>
    %390 = vector.shape_cast %389 : vector<1x8x32xf32> to vector<8x32xf32>
    %391 = vector.shape_cast %387 : vector<8x32xf32> to vector<1x8x32xf32>
    tpu.vector_store %arg5[%388, %c0_87, %c0_88], %391 {strides = array<i32>} : memref<8x8x32xf32, #tpu.memory_space<vmem>>, vector<1x8x32xf32>,
    %c6_i32 = arith.constant 6 : i32
    %392 = arith.index_cast %c6_i32 : i32 to index
    %c0_89 = arith.constant 0 : index
    %c0_90 = arith.constant 0 : index
    %393 = vector.load %arg1[%392, %c0_89, %c0_90] : memref<8x8x128xf32, #tpu.memory_space<vmem>>, vector<1x8x128xf32>
    %394 = vector.shape_cast %393 : vector<1x8x128xf32> to vector<8x128xf32>
    %cst_91 = arith.constant dense<0.000000e+00> : vector<8x128xf32>
    %395 = tpu.matmul %358, %3, %cst_91 {dimension_numbers = #tpu.dot_dimension_numbers<[1], [0], [0], [1], [0, 0, 1, 1], [], []>} : vector<8x32xf32>, vector<32x128xf32>, vector<8x128xf32> -> vector<8x128xf32>
    %396 = arith.addf %394, %395 : vector<8x128xf32>
    %397 = vector.extract_strided_slice %396 {offsets = [0, 0], sizes = [8, 32], strides = [1, 1]} : vector<8x128xf32> to vector<8x32xf32>
    %398 = vector.extract_strided_slice %396 {offsets = [0, 32], sizes = [8, 32], strides = [1, 1]} : vector<8x128xf32> to vector<8x32xf32>
    %399 = vector.extract_strided_slice %396 {offsets = [0, 64], sizes = [8, 32], strides = [1, 1]} : vector<8x128xf32> to vector<8x32xf32>
    %400 = vector.extract_strided_slice %396 {offsets = [0, 96], sizes = [8, 32], strides = [1, 1]} : vector<8x128xf32> to vector<8x32xf32>
    %401 = arith.negf %398 : vector<8x32xf32>
    %402 = math.exp %401 : vector<8x32xf32>
    %cst_92 = arith.constant 1.000000e+00 : f32
    %403 = vector.broadcast %cst_92 : f32 to vector<8x32xf32>
    %404 = arith.addf %403, %402 : vector<8x32xf32>
    %405 = arith.divf %403, %404 : vector<8x32xf32>
    %406 = arith.mulf %405, %351 : vector<8x32xf32>
    %407 = arith.negf %397 : vector<8x32xf32>
    %408 = math.exp %407 : vector<8x32xf32>
    %cst_93 = arith.constant 1.000000e+00 : f32
    %409 = vector.broadcast %cst_93 : f32 to vector<8x32xf32>
    %410 = arith.addf %409, %408 : vector<8x32xf32>
    %411 = arith.divf %409, %410 : vector<8x32xf32>
    %412 = math.tanh %399 : vector<8x32xf32>
    %413 = arith.mulf %411, %412 : vector<8x32xf32>
    %414 = arith.addf %406, %413 : vector<8x32xf32>
    %415 = arith.negf %400 : vector<8x32xf32>
    %416 = math.exp %415 : vector<8x32xf32>
    %cst_94 = arith.constant 1.000000e+00 : f32
    %417 = vector.broadcast %cst_94 : f32 to vector<8x32xf32>
    %418 = arith.addf %417, %416 : vector<8x32xf32>
    %419 = arith.divf %417, %418 : vector<8x32xf32>
    %420 = math.tanh %414 : vector<8x32xf32>
    %421 = arith.mulf %419, %420 : vector<8x32xf32>
    %422 = tpu.concatenate %421, %387 in 1 : vector<8x32xf32>, vector<8x32xf32> -> vector<8x64xf32>
    %cst_95 = arith.constant dense<0.000000e+00> : vector<8x128xf32>
    %423 = tpu.matmul %422, %4, %cst_95 {dimension_numbers = #tpu.dot_dimension_numbers<[1], [0], [0], [1], [0, 0, 1, 1], [], []>} : vector<8x64xf32>, vector<64x128xf32>, vector<8x128xf32> -> vector<8x128xf32>
    %424 = vector.broadcast %5 : vector<1x128xf32> to vector<8x128xf32>
    %425 = arith.addf %423, %424 : vector<8x128xf32>
    %426 = vector.extract_strided_slice %425 {offsets = [0, 0], sizes = [8, 32], strides = [1, 1]} : vector<8x128xf32> to vector<8x32xf32>
    %427 = vector.extract_strided_slice %425 {offsets = [0, 32], sizes = [8, 32], strides = [1, 1]} : vector<8x128xf32> to vector<8x32xf32>
    %428 = vector.extract_strided_slice %425 {offsets = [0, 64], sizes = [8, 32], strides = [1, 1]} : vector<8x128xf32> to vector<8x32xf32>
    %429 = vector.extract_strided_slice %425 {offsets = [0, 96], sizes = [8, 32], strides = [1, 1]} : vector<8x128xf32> to vector<8x32xf32>
    %430 = arith.negf %427 : vector<8x32xf32>
    %431 = math.exp %430 : vector<8x32xf32>
    %cst_96 = arith.constant 1.000000e+00 : f32
    %432 = vector.broadcast %cst_96 : f32 to vector<8x32xf32>
    %433 = arith.addf %432, %431 : vector<8x32xf32>
    %434 = arith.divf %432, %433 : vector<8x32xf32>
    %435 = arith.mulf %434, %380 : vector<8x32xf32>
    %436 = arith.negf %426 : vector<8x32xf32>
    %437 = math.exp %436 : vector<8x32xf32>
    %cst_97 = arith.constant 1.000000e+00 : f32
    %438 = vector.broadcast %cst_97 : f32 to vector<8x32xf32>
    %439 = arith.addf %438, %437 : vector<8x32xf32>
    %440 = arith.divf %438, %439 : vector<8x32xf32>
    %441 = math.tanh %428 : vector<8x32xf32>
    %442 = arith.mulf %440, %441 : vector<8x32xf32>
    %443 = arith.addf %435, %442 : vector<8x32xf32>
    %444 = arith.negf %429 : vector<8x32xf32>
    %445 = math.exp %444 : vector<8x32xf32>
    %cst_98 = arith.constant 1.000000e+00 : f32
    %446 = vector.broadcast %cst_98 : f32 to vector<8x32xf32>
    %447 = arith.addf %446, %445 : vector<8x32xf32>
    %448 = arith.divf %446, %447 : vector<8x32xf32>
    %449 = math.tanh %443 : vector<8x32xf32>
    %450 = arith.mulf %448, %449 : vector<8x32xf32>
    %451 = arith.index_cast %c6_i32 : i32 to index
    %c0_99 = arith.constant 0 : index
    %c0_100 = arith.constant 0 : index
    %452 = vector.load %arg5[%451, %c0_99, %c0_100] : memref<8x8x32xf32, #tpu.memory_space<vmem>>, vector<1x8x32xf32>
    %453 = vector.shape_cast %452 : vector<1x8x32xf32> to vector<8x32xf32>
    %454 = vector.shape_cast %450 : vector<8x32xf32> to vector<1x8x32xf32>
    tpu.vector_store %arg5[%451, %c0_99, %c0_100], %454 {strides = array<i32>} : memref<8x8x32xf32, #tpu.memory_space<vmem>>, vector<1x8x32xf32>,
    %c7_i32 = arith.constant 7 : i32
    %455 = arith.index_cast %c7_i32 : i32 to index
    %c0_101 = arith.constant 0 : index
    %c0_102 = arith.constant 0 : index
    %456 = vector.load %arg1[%455, %c0_101, %c0_102] : memref<8x8x128xf32, #tpu.memory_space<vmem>>, vector<1x8x128xf32>
    %457 = vector.shape_cast %456 : vector<1x8x128xf32> to vector<8x128xf32>
    %cst_103 = arith.constant dense<0.000000e+00> : vector<8x128xf32>
    %458 = tpu.matmul %421, %3, %cst_103 {dimension_numbers = #tpu.dot_dimension_numbers<[1], [0], [0], [1], [0, 0, 1, 1], [], []>} : vector<8x32xf32>, vector<32x128xf32>, vector<8x128xf32> -> vector<8x128xf32>
    %459 = arith.addf %457, %458 : vector<8x128xf32>
    %460 = vector.extract_strided_slice %459 {offsets = [0, 0], sizes = [8, 32], strides = [1, 1]} : vector<8x128xf32> to vector<8x32xf32>
    %461 = vector.extract_strided_slice %459 {offsets = [0, 32], sizes = [8, 32], strides = [1, 1]} : vector<8x128xf32> to vector<8x32xf32>
    %462 = vector.extract_strided_slice %459 {offsets = [0, 64], sizes = [8, 32], strides = [1, 1]} : vector<8x128xf32> to vector<8x32xf32>
    %463 = vector.extract_strided_slice %459 {offsets = [0, 96], sizes = [8, 32], strides = [1, 1]} : vector<8x128xf32> to vector<8x32xf32>
    %464 = arith.negf %461 : vector<8x32xf32>
    %465 = math.exp %464 : vector<8x32xf32>
    %cst_104 = arith.constant 1.000000e+00 : f32
    %466 = vector.broadcast %cst_104 : f32 to vector<8x32xf32>
    %467 = arith.addf %466, %465 : vector<8x32xf32>
    %468 = arith.divf %466, %467 : vector<8x32xf32>
    %469 = arith.mulf %468, %414 : vector<8x32xf32>
    %470 = arith.negf %460 : vector<8x32xf32>
    %471 = math.exp %470 : vector<8x32xf32>
    %cst_105 = arith.constant 1.000000e+00 : f32
    %472 = vector.broadcast %cst_105 : f32 to vector<8x32xf32>
    %473 = arith.addf %472, %471 : vector<8x32xf32>
    %474 = arith.divf %472, %473 : vector<8x32xf32>
    %475 = math.tanh %462 : vector<8x32xf32>
    %476 = arith.mulf %474, %475 : vector<8x32xf32>
    %477 = arith.addf %469, %476 : vector<8x32xf32>
    %478 = arith.negf %463 : vector<8x32xf32>
    %479 = math.exp %478 : vector<8x32xf32>
    %cst_106 = arith.constant 1.000000e+00 : f32
    %480 = vector.broadcast %cst_106 : f32 to vector<8x32xf32>
    %481 = arith.addf %480, %479 : vector<8x32xf32>
    %482 = arith.divf %480, %481 : vector<8x32xf32>
    %483 = math.tanh %477 : vector<8x32xf32>
    %484 = arith.mulf %482, %483 : vector<8x32xf32>
    %485 = tpu.concatenate %484, %450 in 1 : vector<8x32xf32>, vector<8x32xf32> -> vector<8x64xf32>
    %cst_107 = arith.constant dense<0.000000e+00> : vector<8x128xf32>
    %486 = tpu.matmul %485, %4, %cst_107 {dimension_numbers = #tpu.dot_dimension_numbers<[1], [0], [0], [1], [0, 0, 1, 1], [], []>} : vector<8x64xf32>, vector<64x128xf32>, vector<8x128xf32> -> vector<8x128xf32>
    %487 = vector.broadcast %5 : vector<1x128xf32> to vector<8x128xf32>
    %488 = arith.addf %486, %487 : vector<8x128xf32>
    %489 = vector.extract_strided_slice %488 {offsets = [0, 0], sizes = [8, 32], strides = [1, 1]} : vector<8x128xf32> to vector<8x32xf32>
    %490 = vector.extract_strided_slice %488 {offsets = [0, 32], sizes = [8, 32], strides = [1, 1]} : vector<8x128xf32> to vector<8x32xf32>
    %491 = vector.extract_strided_slice %488 {offsets = [0, 64], sizes = [8, 32], strides = [1, 1]} : vector<8x128xf32> to vector<8x32xf32>
    %492 = vector.extract_strided_slice %488 {offsets = [0, 96], sizes = [8, 32], strides = [1, 1]} : vector<8x128xf32> to vector<8x32xf32>
    %493 = arith.negf %490 : vector<8x32xf32>
    %494 = math.exp %493 : vector<8x32xf32>
    %cst_108 = arith.constant 1.000000e+00 : f32
    %495 = vector.broadcast %cst_108 : f32 to vector<8x32xf32>
    %496 = arith.addf %495, %494 : vector<8x32xf32>
    %497 = arith.divf %495, %496 : vector<8x32xf32>
    %498 = arith.mulf %497, %443 : vector<8x32xf32>
    %499 = arith.negf %489 : vector<8x32xf32>
    %500 = math.exp %499 : vector<8x32xf32>
    %cst_109 = arith.constant 1.000000e+00 : f32
    %501 = vector.broadcast %cst_109 : f32 to vector<8x32xf32>
    %502 = arith.addf %501, %500 : vector<8x32xf32>
    %503 = arith.divf %501, %502 : vector<8x32xf32>
    %504 = math.tanh %491 : vector<8x32xf32>
    %505 = arith.mulf %503, %504 : vector<8x32xf32>
    %506 = arith.addf %498, %505 : vector<8x32xf32>
    %507 = arith.negf %492 : vector<8x32xf32>
    %508 = math.exp %507 : vector<8x32xf32>
    %cst_110 = arith.constant 1.000000e+00 : f32
    %509 = vector.broadcast %cst_110 : f32 to vector<8x32xf32>
    %510 = arith.addf %509, %508 : vector<8x32xf32>
    %511 = arith.divf %509, %510 : vector<8x32xf32>
    %512 = math.tanh %506 : vector<8x32xf32>
    %513 = arith.mulf %511, %512 : vector<8x32xf32>
    %514 = arith.index_cast %c7_i32 : i32 to index
    %c0_111 = arith.constant 0 : index
    %c0_112 = arith.constant 0 : index
    %515 = vector.load %arg5[%514, %c0_111, %c0_112] : memref<8x8x32xf32, #tpu.memory_space<vmem>>, vector<1x8x32xf32>
    %516 = vector.shape_cast %515 : vector<1x8x32xf32> to vector<8x32xf32>
    %517 = vector.shape_cast %513 : vector<8x32xf32> to vector<1x8x32xf32>
    tpu.vector_store %arg5[%514, %c0_111, %c0_112], %517 {strides = array<i32>} : memref<8x8x32xf32, #tpu.memory_space<vmem>>, vector<1x8x32xf32>,
    %c8_i32 = arith.constant 8 : i32
    %c0_113 = arith.constant 0 : index
    %c0_114 = arith.constant 0 : index
    %c0_115 = arith.constant 0 : index
    %518 = vector.load %arg8[%c0_113, %c0_114, %c0_115] : memref<2x8x32xf32, #tpu.memory_space<vmem>>, vector<1x8x32xf32>
    %519 = vector.shape_cast %518 : vector<1x8x32xf32> to vector<8x32xf32>
    %520 = vector.shape_cast %484 : vector<8x32xf32> to vector<1x8x32xf32>
    tpu.vector_store %arg8[%c0_113, %c0_114, %c0_115], %520 {strides = array<i32>} : memref<2x8x32xf32, #tpu.memory_space<vmem>>, vector<1x8x32xf32>,
    %c0_116 = arith.constant 0 : index
    %c0_117 = arith.constant 0 : index
    %c0_118 = arith.constant 0 : index
    %521 = vector.load %arg9[%c0_116, %c0_117, %c0_118] : memref<2x8x32xf32, #tpu.memory_space<vmem>>, vector<1x8x32xf32>
    %522 = vector.shape_cast %521 : vector<1x8x32xf32> to vector<8x32xf32>
    %523 = vector.shape_cast %477 : vector<8x32xf32> to vector<1x8x32xf32>
    tpu.vector_store %arg9[%c0_116, %c0_117, %c0_118], %523 {strides = array<i32>} : memref<2x8x32xf32, #tpu.memory_space<vmem>>, vector<1x8x32xf32>,
    %c1_119 = arith.constant 1 : index
    %c0_120 = arith.constant 0 : index
    %c0_121 = arith.constant 0 : index
    %524 = vector.load %arg8[%c1_119, %c0_120, %c0_121] : memref<2x8x32xf32, #tpu.memory_space<vmem>>, vector<1x8x32xf32>
    %525 = vector.shape_cast %524 : vector<1x8x32xf32> to vector<8x32xf32>
    %526 = vector.shape_cast %513 : vector<8x32xf32> to vector<1x8x32xf32>
    tpu.vector_store %arg8[%c1_119, %c0_120, %c0_121], %526 {strides = array<i32>} : memref<2x8x32xf32, #tpu.memory_space<vmem>>, vector<1x8x32xf32>,
    %c1_122 = arith.constant 1 : index
    %c0_123 = arith.constant 0 : index
    %c0_124 = arith.constant 0 : index
    %527 = vector.load %arg9[%c1_122, %c0_123, %c0_124] : memref<2x8x32xf32, #tpu.memory_space<vmem>>, vector<1x8x32xf32>
    %528 = vector.shape_cast %527 : vector<1x8x32xf32> to vector<8x32xf32>
    %529 = vector.shape_cast %506 : vector<8x32xf32> to vector<1x8x32xf32>
    tpu.vector_store %arg9[%c1_122, %c0_123, %c0_124], %529 {strides = array<i32>} : memref<2x8x32xf32, #tpu.memory_space<vmem>>, vector<1x8x32xf32>,
    %c0_i32_125 = arith.constant 0 : i32
    %530 = arith.cmpi eq, %arg0, %c0_i32_125 : i32
    %531 = arith.extui %530 : i1 to i32
    %c0_i32_126 = arith.constant 0 : i32
    %532 = arith.cmpi ne, %531, %c0_i32_126 : i32
    scf.if %532 {
      %c0_127 = arith.constant 0 : index
      %c0_128 = arith.constant 0 : index
      %c0_129 = arith.constant 0 : index
      %533 = vector.load %arg6[%c0_127, %c0_128, %c0_129] : memref<2x8x32xf32, #tpu.memory_space<vmem>>, vector<1x8x32xf32>
      %534 = vector.shape_cast %533 : vector<1x8x32xf32> to vector<8x32xf32>
      %535 = vector.shape_cast %484 : vector<8x32xf32> to vector<1x8x32xf32>
      tpu.vector_store %arg6[%c0_127, %c0_128, %c0_129], %535 {strides = array<i32>} : memref<2x8x32xf32, #tpu.memory_space<vmem>>, vector<1x8x32xf32>,
      %c1_130 = arith.constant 1 : index
      %c0_131 = arith.constant 0 : index
      %c0_132 = arith.constant 0 : index
      %536 = vector.load %arg6[%c1_130, %c0_131, %c0_132] : memref<2x8x32xf32, #tpu.memory_space<vmem>>, vector<1x8x32xf32>
      %537 = vector.shape_cast %536 : vector<1x8x32xf32> to vector<8x32xf32>
      %538 = vector.shape_cast %513 : vector<8x32xf32> to vector<1x8x32xf32>
      tpu.vector_store %arg6[%c1_130, %c0_131, %c0_132], %538 {strides = array<i32>} : memref<2x8x32xf32, #tpu.memory_space<vmem>>, vector<1x8x32xf32>,
      %c0_133 = arith.constant 0 : index
      %c0_134 = arith.constant 0 : index
      %c0_135 = arith.constant 0 : index
      %539 = vector.load %arg7[%c0_133, %c0_134, %c0_135] : memref<2x8x32xf32, #tpu.memory_space<vmem>>, vector<1x8x32xf32>
      %540 = vector.shape_cast %539 : vector<1x8x32xf32> to vector<8x32xf32>
      %541 = vector.shape_cast %477 : vector<8x32xf32> to vector<1x8x32xf32>
      tpu.vector_store %arg7[%c0_133, %c0_134, %c0_135], %541 {strides = array<i32>} : memref<2x8x32xf32, #tpu.memory_space<vmem>>, vector<1x8x32xf32>,
      %c1_136 = arith.constant 1 : index
      %c0_137 = arith.constant 0 : index
      %c0_138 = arith.constant 0 : index
      %542 = vector.load %arg7[%c1_136, %c0_137, %c0_138] : memref<2x8x32xf32, #tpu.memory_space<vmem>>, vector<1x8x32xf32>
      %543 = vector.shape_cast %542 : vector<1x8x32xf32> to vector<8x32xf32>
      %544 = vector.shape_cast %506 : vector<8x32xf32> to vector<1x8x32xf32>
      tpu.vector_store %arg7[%c1_136, %c0_137, %c0_138], %544 {strides = array<i32>} : memref<2x8x32xf32, #tpu.memory_space<vmem>>, vector<1x8x32xf32>,
    } else {
    }
    return
  }
  func.func @transform_0(%arg0: i32) -> (i32, i32, i32) {
    %c0_i32 = arith.constant 0 : i32
    %c0_i32_0 = arith.constant 0 : i32
    %c0_i32_1 = arith.constant 0 : i32
    return %arg0, %c0_i32, %c0_i32_0 : i32, i32, i32
  }
  func.func @transform_1(%arg0: i32) -> (i32, i32) {
    %c0_i32 = arith.constant 0 : i32
    %c0_i32_0 = arith.constant 0 : i32
    %c0_i32_1 = arith.constant 0 : i32
    return %c0_i32, %c0_i32_0 : i32, i32
  }
  func.func @transform_2(%arg0: i32) -> (i32, i32) {
    %c0_i32 = arith.constant 0 : i32
    %c0_i32_0 = arith.constant 0 : i32
    %c0_i32_1 = arith.constant 0 : i32
    return %c0_i32, %c0_i32_0 : i32, i32
  }
  func.func @transform_3(%arg0: i32) -> (i32, i32) {
    %c0_i32 = arith.constant 0 : i32
    %c0_i32_0 = arith.constant 0 : i32
    %c0_i32_1 = arith.constant 0 : i32
    return %c0_i32, %c0_i32_0 : i32, i32
  }
  func.func @transform_4(%arg0: i32) -> (i32, i32, i32) {
    %c0_i32 = arith.constant 0 : i32
    %c0_i32_0 = arith.constant 0 : i32
    %c0_i32_1 = arith.constant 0 : i32
    return %arg0, %c0_i32, %c0_i32_0 : i32, i32, i32
  }
  func.func @transform_5(%arg0: i32) -> (i32, i32, i32) {
    %c0_i32 = arith.constant 0 : i32
    %c0_i32_0 = arith.constant 0 : i32
    %c0_i32_1 = arith.constant 0 : i32
    %c0_i32_2 = arith.constant 0 : i32
    return %c0_i32, %c0_i32_0, %c0_i32_1 : i32, i32, i32
  }
  func.func @transform_6(%arg0: i32) -> (i32, i32, i32) {
    %c0_i32 = arith.constant 0 : i32
    %c0_i32_0 = arith.constant 0 : i32
    %c0_i32_1 = arith.constant 0 : i32
    %c0_i32_2 = arith.constant 0 : i32
    return %c0_i32, %c0_i32_0, %c0_i32_1 : i32, i32, i32
  }
}

module attributes {stable_mosaic.version = 11 : i64} {
  func.func @_matmul_bias_kernel(%arg0: i32, %arg1: i32, %arg2: memref<64x16xf32, #tpu.memory_space<vmem>>, %arg3: memref<16x128xf32, #tpu.memory_space<vmem>>, %arg4: memref<1x128xf32, #tpu.memory_space<vmem>>, %arg5: memref<64x128xf32, #tpu.memory_space<vmem>>) attributes {dimension_semantics = [#tpu.dimension_semantics<parallel>, #tpu.dimension_semantics<parallel>], iteration_bounds = array<i64: 1, 1>, scalar_prefetch = 0 : i64, scratch_operands = 0 : i64, tpu.core_type = #tpu.core_type<tc>, window_params = [{transform_indices = @transform_0, window_bounds = array<i64: 64, 16>}, {transform_indices = @transform_1, window_bounds = array<i64: 16, 128>}, {transform_indices = @transform_2, window_bounds = array<i64: 1, 128>}, {transform_indices = @transform_3, window_bounds = array<i64: 64, 128>}]} {
    %c0 = arith.constant 0 : index
    %c0_0 = arith.constant 0 : index
    %0 = vector.load %arg2[%c0, %c0_0] : memref<64x16xf32, #tpu.memory_space<vmem>>, vector<64x16xf32>
    %c0_1 = arith.constant 0 : index
    %c0_2 = arith.constant 0 : index
    %1 = vector.load %arg3[%c0_1, %c0_2] : memref<16x128xf32, #tpu.memory_space<vmem>>, vector<16x128xf32>
    %cst = arith.constant dense<0.000000e+00> : vector<64x128xf32>
    %2 = tpu.matmul %0, %1, %cst {dimension_numbers = #tpu.dot_dimension_numbers<[1], [0], [0], [1], [0, 0, 1, 1], [], []>} : vector<64x16xf32>, vector<16x128xf32>, vector<64x128xf32> -> vector<64x128xf32>
    %c0_3 = arith.constant 0 : index
    %c0_4 = arith.constant 0 : index
    %3 = vector.load %arg4[%c0_3, %c0_4] : memref<1x128xf32, #tpu.memory_space<vmem>>, vector<1x128xf32>
    %4 = vector.broadcast %3 : vector<1x128xf32> to vector<64x128xf32>
    %5 = arith.addf %2, %4 : vector<64x128xf32>
    %c0_5 = arith.constant 0 : index
    %c0_6 = arith.constant 0 : index
    %6 = vector.load %arg5[%c0_5, %c0_6] : memref<64x128xf32, #tpu.memory_space<vmem>>, vector<64x128xf32>
    tpu.vector_store %arg5[%c0_5, %c0_6], %5 {strides = array<i32>} : memref<64x128xf32, #tpu.memory_space<vmem>>, vector<64x128xf32>,
    return
  }
  func.func @transform_0(%arg0: i32, %arg1: i32) -> (i32, i32) {
    %c0_i32 = arith.constant 0 : i32
    %c0_i32_0 = arith.constant 0 : i32
    return %arg0, %c0_i32 : i32, i32
  }
  func.func @transform_1(%arg0: i32, %arg1: i32) -> (i32, i32) {
    %c0_i32 = arith.constant 0 : i32
    %c0_i32_0 = arith.constant 0 : i32
    return %c0_i32, %arg1 : i32, i32
  }
  func.func @transform_2(%arg0: i32, %arg1: i32) -> (i32, i32) {
    %c0_i32 = arith.constant 0 : i32
    %c0_i32_0 = arith.constant 0 : i32
    return %c0_i32, %arg1 : i32, i32
  }
  func.func @transform_3(%arg0: i32, %arg1: i32) -> (i32, i32) {
    %c0_i32 = arith.constant 0 : i32
    return %arg0, %arg1 : i32, i32
  }
}

module attributes {stable_mosaic.version = 11 : i64} {
  func.func @_matmul_bias_kernel(%arg0: i32, %arg1: i32, %arg2: memref<16x32xf32, #tpu.memory_space<vmem>>, %arg3: memref<32x128xf32, #tpu.memory_space<vmem>>, %arg4: memref<1x128xf32, #tpu.memory_space<vmem>>, %arg5: memref<16x128xf32, #tpu.memory_space<vmem>>) attributes {dimension_semantics = [#tpu.dimension_semantics<parallel>, #tpu.dimension_semantics<parallel>], iteration_bounds = array<i64: 1, 1>, scalar_prefetch = 0 : i64, scratch_operands = 0 : i64, tpu.core_type = #tpu.core_type<tc>, window_params = [{transform_indices = @transform_0, window_bounds = array<i64: 16, 32>}, {transform_indices = @transform_1, window_bounds = array<i64: 32, 128>}, {transform_indices = @transform_2, window_bounds = array<i64: 1, 128>}, {transform_indices = @transform_3, window_bounds = array<i64: 16, 128>}]} {
    %c0 = arith.constant 0 : index
    %c0_0 = arith.constant 0 : index
    %0 = vector.load %arg2[%c0, %c0_0] : memref<16x32xf32, #tpu.memory_space<vmem>>, vector<16x32xf32>
    %c0_1 = arith.constant 0 : index
    %c0_2 = arith.constant 0 : index
    %1 = vector.load %arg3[%c0_1, %c0_2] : memref<32x128xf32, #tpu.memory_space<vmem>>, vector<32x128xf32>
    %cst = arith.constant dense<0.000000e+00> : vector<16x128xf32>
    %2 = tpu.matmul %0, %1, %cst {dimension_numbers = #tpu.dot_dimension_numbers<[1], [0], [0], [1], [0, 0, 1, 1], [], []>} : vector<16x32xf32>, vector<32x128xf32>, vector<16x128xf32> -> vector<16x128xf32>
    %c0_3 = arith.constant 0 : index
    %c0_4 = arith.constant 0 : index
    %3 = vector.load %arg4[%c0_3, %c0_4] : memref<1x128xf32, #tpu.memory_space<vmem>>, vector<1x128xf32>
    %4 = vector.broadcast %3 : vector<1x128xf32> to vector<16x128xf32>
    %5 = arith.addf %2, %4 : vector<16x128xf32>
    %c0_5 = arith.constant 0 : index
    %c0_6 = arith.constant 0 : index
    %6 = vector.load %arg5[%c0_5, %c0_6] : memref<16x128xf32, #tpu.memory_space<vmem>>, vector<16x128xf32>
    tpu.vector_store %arg5[%c0_5, %c0_6], %5 {strides = array<i32>} : memref<16x128xf32, #tpu.memory_space<vmem>>, vector<16x128xf32>,
    return
  }
  func.func @transform_0(%arg0: i32, %arg1: i32) -> (i32, i32) {
    %c0_i32 = arith.constant 0 : i32
    %c0_i32_0 = arith.constant 0 : i32
    return %arg0, %c0_i32 : i32, i32
  }
  func.func @transform_1(%arg0: i32, %arg1: i32) -> (i32, i32) {
    %c0_i32 = arith.constant 0 : i32
    %c0_i32_0 = arith.constant 0 : i32
    return %c0_i32, %arg1 : i32, i32
  }
  func.func @transform_2(%arg0: i32, %arg1: i32) -> (i32, i32) {
    %c0_i32 = arith.constant 0 : i32
    %c0_i32_0 = arith.constant 0 : i32
    return %c0_i32, %arg1 : i32, i32
  }
  func.func @transform_3(%arg0: i32, %arg1: i32) -> (i32, i32) {
    %c0_i32 = arith.constant 0 : i32
    return %arg0, %arg1 : i32, i32
  }
}

</mosaic_0001>

<bundles_post_ra>
// kernel: lstm2_forward.5
= control target key start
LH: loop header
LB: loop body
LE: loop exit
PB: predicated region body
PF: predicated region fallthrough
CT: control target
= control target key end

     0   :  { %vm27_vm0 = vcmask 261120   ;;  %s190_s1 = inlined_call_operand.vmem [shape: f32[32,128], index: 1, kind: input, shape index: {}]   ;;  %s191_s0 = inlined_call_operand.vmem [shape: f32[16,32], index: 0, kind: input, shape index: {}]   ;;  %s192_s2 = inlined_call_operand.vmem [shape: f32[1,128], index: 2, kind: input, shape index: {}]   ;;  %s193_s3 = inlined_call_operand.vmem [shape: f32[16,128], index: 3, kind: output, shape index: {}]  }
   0x1   :  { %v16_v0 = vld [vmem:[%s190_s1] sm:$0xff]  ;;  %v17_v1 = vld [vmem:[%s190_s1 + $0x8] sm:$0xff]  ;;  %v18_v2 = vld [vmem:[%s190_s1 + $0x10] sm:$0xff] }
   0x2   :  { %v135_v3 = vpack.c.bf16 %v17_v1, %v16_v0  ;;  %v19_v4 = vld [vmem:[%s190_s1 + $0x18] sm:$0xff]  ;;  %v14_v5 = vld [vmem:[%s191_s0] sm:$0xff]  ;;  %v15_v7 = vld [vmem:[%s191_s0 + $0x8] sm:$0xff] }
   0x3   :  { %v139_v6 = vpack.c.bf16 %v19_v4, %v18_v2  ;;  %132 = vmatprep.mubr.msk.f32.mxu0 %vm27_vm0, %v14_v5  ;;  %v115_v8 = vld [vmem:[%s192_s2] ss:$0 sm:$0xff] }
   0x4   :  { %136 = vmatprep.subr.bf16.mxu0 %v135_v3 }
   0x5   :  { %138 = vmatpush3.bf16.msra.mxu0 %v135_v3 }
   0x6   :  { %140 = vmatprep.subr.bf16.mxu0 %v139_v6 }
   0x9   :  { %142 = vmatpush3.bf16.msra.mxu0 %v139_v6 }
   0xc   :  { %133 = vmatmul.mubr.msk.f32.vlgmr.msra.gmra.mrb[0].mxu0 %vm27_vm0, %v15_v7 }
  0xdf   :  { %v134_v9 = vpop.f32.mrb[0].mxu0 }
  0xe0   :  { %v106_v10 = vadd.f32 %v134_v9, %v115_v8  ;;  %v100_v11 = vpop.f32.mrb[1].mxu0 }
  0xe1   :  { %v101_v12 = vadd.f32 %v115_v8, %v100_v11 }
  0xe2   :  { %110 = vst [vmem:[%s193_s3 + $0x8] sm:$0xff] %v106_v10 }
  0xe3   :  { %109 = vst [vmem:[%s193_s3] sm:$0xff] %v101_v12 }

// kernel: lstm2_forward.3
= control target key start
LH: loop header
LB: loop body
LE: loop exit
PB: predicated region body
PF: predicated region fallthrough
CT: control target
= control target key end

     0   :  { %vm31_vm0 = vcmask 130048   ;;  %s299_s1 = inlined_call_operand.vmem [shape: f32[16,128], index: 1, kind: input, shape index: {}]   ;;  %s300_s0 = inlined_call_operand.vmem [shape: f32[64,16], index: 0, kind: input, shape index: {}]   ;;  %s301_s2 = inlined_call_operand.vmem [shape: f32[1,128], index: 2, kind: input, shape index: {}]   ;;  %s302_s3 = inlined_call_operand.vmem [shape: f32[64,128], index: 3, kind: output, shape index: {}]  }
   0x1   :  { %v22_v0 = vld [vmem:[%s299_s1] sm:$0xff]  ;;  %v23_v1 = vld [vmem:[%s299_s1 + $0x8] sm:$0xff]  ;;  %v16_v7 = vld [vmem:[%s300_s0 + $0x10] sm:$0xff] }
   0x2   :  { %v14_v2 = vld [vmem:[%s300_s0] sm:$0xff]  ;;  %v208_v3 = vpack.c.bf16 %v23_v1, %v22_v0  ;;  %v15_v5 = vld [vmem:[%s300_s0 + $0x8] sm:$0xff]  ;;  %v20_v8 = vld [vmem:[%s300_s0 + $0x30] sm:$0xff] }
   0x3   :  { %196 = vmatprep.mubr.msk.f32.mxu0 %vm31_vm0, %v14_v2  ;;  %v18_v4 = vld [vmem:[%s300_s0 + $0x20] sm:$0xff]  ;;  %v19_v6 = vld [vmem:[%s300_s0 + $0x28] sm:$0xff]  ;;  %v17_v9 = vld [vmem:[%s300_s0 + $0x18] sm:$0xff] }
   0x4   :  { %202 = vmatprep.mubr.msk.f32.mxu1 %vm31_vm0, %v18_v4  ;;  %209 = vmatprep.subr.bf16.mxu0 %v208_v3  ;;  %v21_v10 = vld [vmem:[%s300_s0 + $0x38] sm:$0xff]  ;;  %v173_v11 = vld [vmem:[%s301_s2] ss:$0 sm:$0xff] }
   0x5   :  { %212 = vmatprep.subr.bf16.mxu1 %v208_v3  ;;  %211 = vmatpush3.bf16.msra.mxu0 %v208_v3 }
   0x6   :  { %213 = vmatpush3.bf16.msra.mxu1 %v208_v3 }
   0x8   :  { %197 = vmatmul.mubr.msk.f32.vlgmr.msra.gmra.mrb[0].mxu0 %vm31_vm0, %v15_v5 }
   0x9   :  { %203 = vmatmul.mubr.msk.f32.vlgmr.msra.gmra.mrb[0].mxu1 %vm31_vm0, %v19_v6  ;;  %199 = vmatprep.mubr.msk.f32.mxu0 %vm31_vm0, %v16_v7 }
   0xa   :  { %205 = vmatprep.mubr.msk.f32.mxu1 %vm31_vm0, %v20_v8 }
   0xc   :  { %200 = vmatmul.mubr.msk.f32.gmra.mrb[2].mxu0 %vm31_vm0, %v17_v9 }
   0xd   :  { %206 = vmatmul.mubr.msk.f32.gmra.mrb[2].mxu1 %vm31_vm0, %v21_v10 }
  0xdb   :  { %v198_v12 = vpop.f32.mrb[0].mxu0 }
  0xdc   :  { %v204_v13 = vpop.f32.mrb[0].mxu1  ;;  %v128_v14 = vadd.f32 %v198_v12, %v173_v11  ;;  %v122_v16 = vpop.f32.mrb[1].mxu0 }
  0xdd   :  { %v148_v15 = vadd.f32 %v204_v13, %v173_v11  ;;  %v142_v17 = vpop.f32.mrb[1].mxu1  ;;  %v123_v18 = vadd.f32 %v173_v11, %v122_v16 }
  0xde   :  { %v143_v19 = vadd.f32 %v173_v11, %v142_v17  ;;  %162 = vst [vmem:[%s302_s3 + $0x8] sm:$0xff] %v128_v14 }
  0xdf   :  { %166 = vst [vmem:[%s302_s3 + $0x28] sm:$0xff] %v148_v15  ;;  %161 = vst [vmem:[%s302_s3] sm:$0xff] %v123_v18  ;;  %v201_v20 = vpop.f32.mrb[2].mxu0 }
  0xe0   :  { %165 = vst [vmem:[%s302_s3 + $0x20] sm:$0xff] %v143_v19  ;;  %v207_v21 = vpop.f32.mrb[2].mxu1  ;;  %v138_v22 = vadd.f32 %v201_v20, %v173_v11  ;;  %v132_v24 = vpop.f32.mrb[3].mxu0 }
  0xe1   :  { %v158_v23 = vadd.f32 %v207_v21, %v173_v11  ;;  %v152_v25 = vpop.f32.mrb[3].mxu1  ;;  %v133_v26 = vadd.f32 %v173_v11, %v132_v24 }
  0xe2   :  { %v153_v27 = vadd.f32 %v173_v11, %v152_v25  ;;  %164 = vst [vmem:[%s302_s3 + $0x18] sm:$0xff] %v138_v22 }
  0xe3   :  { %168 = vst [vmem:[%s302_s3 + $0x38] sm:$0xff] %v158_v23  ;;  %163 = vst [vmem:[%s302_s3 + $0x10] sm:$0xff] %v133_v26 }
  0xe4   :  { %167 = vst [vmem:[%s302_s3 + $0x30] sm:$0xff] %v153_v27 }

// kernel: lstm2_forward.4
= control target key start
LH: loop header
LB: loop body
LE: loop exit
PB: predicated region body
PF: predicated region fallthrough
CT: control target
= control target key end

     0   :  { %vm24_vm0 = vcmask 261120   ;;  %v2456_v0 = vmov 0.0|0.0   ;;  %vm2457_vm1 = vmmov 0   ;;  %v2458_v4 = vmov 0.0   ;;  %s2459_s30 = smov 64   ;;  %s2460_s7 = smov 32   ;;  %s2936_s1 = inlined_call_operand.vmem [shape: f32[32,128], index: 1, kind: input, shape index: {}]   ;;  %s2937_s0 = inlined_call_operand.vmem [shape: f32[8,8,128], index: 0, kind: input, shape index: {}]   ;;  %s2938_s2 = inlined_call_operand.vmem [shape: f32[64,128], index: 2, kind: input, shape index: {}]   ;;  %s2939_s3 = inlined_call_operand.vmem [shape: f32[1,128], index: 3, kind: input, shape index: {}]   ;;  %s2940_s5 = inlined_call_operand.vmem [shape: f32[2,8,32], index: 5, kind: output, shape index: {1}]   ;;  %s2941_s4 = inlined_call_operand.vmem [shape: f32[8,8,32], index: 4, kind: output, shape index: {0}]   ;;  %s2942_s6 = inlined_call_operand.vmem [shape: f32[2,8,32], index: 6, kind: output, shape index: {2}]  }
   0x1   :  { %2178 = vmatprep.subr.bf16.mxu1 %v2456_v0  ;;  %v29_v1 = vld [vmem:[%s2936_s1] sm:$0xff]  ;;  %v30_v2 = vld [vmem:[%s2936_s1 + $0x8] sm:$0xff]  ;;  %v31_v3 = vld [vmem:[%s2936_s1 + $0x10] sm:$0xff]  ;;  %1946 = vmatprep.mubr.msk.f32.mxu1 %vm2457_vm1, %v2458_v4  ;;  %25 = vst.msk [vmem:[#allocation2] sm:$0xff] %vm24_vm0, %v2458_v4  ;;  %vm167_vm2 = vcmask 523264   ;;  %s2461_s16 = smov 96  }
   0x2   :  { %26 = vst.msk [vmem:[#allocation2 + $0x8] sm:$0xff] %vm24_vm0, %v2458_v4  ;;  %27 = vst.msk [vmem:[#allocation3] sm:$0xff] %vm24_vm0, %v2458_v4  ;;  %v2517_v5 = vpack.c.bf16 %v30_v2, %v29_v1  ;;  %v32_v6 = vld [vmem:[%s2936_s1 + $0x18] sm:$0xff]  ;;  %2196 = vmatprep.subr.bf16.mxu0 %v2456_v0  ;;  %1976 = vmatprep.mubr.msk.f32.mxu0 %vm2457_vm1, %v2458_v4  ;;  %v48_v9 = vld [vmem:[%s2937_s0] sm:$0xff] }
   0x3   :  { %28 = vst.msk [vmem:[#allocation3 + $0x8] sm:$0xff] %vm24_vm0, %v2458_v4  ;;  %v2526_v7 = vpack.c.bf16 %v32_v6, %v31_v3  ;;  %v33_v25 = vld [vmem:[%s2938_s2] sm:$0xff]  ;;  %v34_v26 = vld [vmem:[%s2938_s2 + $0x8] sm:$0xff]  ;;  %v35_v27 = vld [vmem:[%s2938_s2 + $0x10] sm:$0xff] }
   0x4   :  { %2180 = vmatpush3.bf16.msra.mxu1 %v2517_v5  ;;  %2198 = vmatpush3.bf16.msra.mxu0 %v2517_v5  ;;  %v2556_v28 = vpack.c.bf16 %v34_v26, %v33_v25  ;;  %v36_v29 = vld [vmem:[%s2938_s2 + $0x18] sm:$0xff]  ;;  %v37_v31 = vld [vmem:[%s2938_s2 + $0x20] sm:$0xff]  ;;  %v38_v32 = vld [vmem:[%s2938_s2 + $0x28] sm:$0xff] }
   0x5   :  { %2181 = vmatprep.subr.bf16.mxu1 %v2456_v0  ;;  %2199 = vmatprep.subr.bf16.mxu0 %v2456_v0  ;;  %v2562_v30 = vpack.c.bf16 %v36_v29, %v35_v27  ;;  %v2572_v33 = vpack.c.bf16 %v38_v32, %v37_v31  ;;  %v39_v34 = vld [vmem:[%s2938_s2 + $0x30] sm:$0xff]  ;;  %v40_v35 = vld [vmem:[%s2938_s2 + $0x38] sm:$0xff]  ;;  %v1782_v44 = vld [vmem:[%s2937_s0 + $0x8] sm:$0xff] }
   0x6   :  { %v2583_v38 = vpack.c.bf16 %v40_v35, %v39_v34  ;;  %v2615_v45 = vld [vmem:[%s2939_s3] ss:$0 sm:$0xff] }
   0x8   :  { %2183 = vmatpush3.bf16.msra.mxu1 %v2526_v7  ;;  %v42_v8 = vld [vmem:[#allocation2] sm:$0xff]  ;;  %2201 = vmatpush3.bf16.msra.mxu0 %v2526_v7 }
   0x9   :  { %2184 = vmatprep.subr.bf16.mxu1 %v2456_v0  ;;  %2202 = vmatprep.subr.bf16.mxu0 %v2456_v0  ;;  %v43_v14 = vld [vmem:[#allocation3] sm:$0xff]  ;;  %v45_v37 = vld [vmem:[#allocation2 + $0x8] sm:$0xff] }
   0xa   :  { %v47_v54 = vld [vmem:[#allocation3 + $0x8] sm:$0xff] }
   0xb   :  { %1947 = vmatmul.mubr.msk.f32.vlgmr.msra.gmra.mrb[0].mxu1 %vm24_vm0, %v42_v8 }
   0xc   :  { %1965 = vmatprep.mubr.msk.f32.mxu1 %vm2457_vm1, %v2458_v4  ;;  %2186 = vmatpush3.bf16.msra.mxu1 %v2556_v28 }
   0xd   :  { %2187 = vmatprep.subr.bf16.mxu1 %v2456_v0 }
  0x10   :  { %2189 = vmatpush3.bf16.msra.mxu1 %v2562_v30 }
  0x11   :  { %2190 = vmatprep.subr.bf16.mxu1 %v2456_v0 }
  0x14   :  { %2192 = vmatpush3.bf16.msra.mxu1 %v2572_v33 }
  0x15   :  { %2193 = vmatprep.subr.bf16.mxu1 %v2456_v0 }
  0x18   :  { %2195 = vmatpush3.bf16.msra.mxu1 %v2583_v38 }
  0x19   :  { %2214 = vmatprep.subr.bf16.mxu1 %v2456_v0 }
  0xde   :  { %v119_v10 = vpop.f32.mrb[0].mxu1 }
  0xdf   :  { %v123_v11 = vadd.f32 %v119_v10, %v48_v9  ;;  %v1948_v12 = vpop.f32.mrb[1].mxu1 }
  0xe1   :  { %2328 = vtanh.f32 %v123_v11  ;;  %v1778_v15 = vmul.f32 -1.442695, %v123_v11 }
  0xe3   :  { %2330 = vpow2.f32 %v1778_v15 }
  0xeb   :  { %v2329_v13 = vpop.eup %2328 }
  0xec   :  { %137 = vrot.lane.b32.xlu0 %v2329_v13, %s2459_s30 }
  0xed   :  { %v2331_v16 = vpop.eup %2330 }
  0xee   :  { %v127_v17 = vadd.f32 1.0, %v2331_v16 }
  0xf0   :  { %131 = vrot.lane.b32.xlu0 %v43_v14, %s2460_s7  ;;  %2332 = vrcp.f32 %v127_v17 }
  0xfa   :  { %v2333_v18 = vpop.eup %2332 }
 0x15e   :  { %v138_v19 = vpop.permute.xlu0 %137 }
 0x15f   :  { %v140_v20 = vmul.f32 %v2333_v18, %v138_v19 }
 0x161   :  { %142 = vrot.lane.b32.xlu1 %v140_v20, %s2460_s7 }
 0x162   :  { %v132_v21 = vpop.permute.xlu0 %131 }
 0x163   :  { %v134_v22 = vmul.f32 %v2333_v18, %v132_v21 }
 0x1d3   :  { %v143_v23 = vpop.permute.xlu1 %142 }
 0x1d4   :  { %v2544_v24 = vadd.f32 %v143_v23, %v134_v22  ;;  %v1788_v23 = vld [vmem:[%s2937_s0 + $0x10] sm:$0xff] }
 0x1d6   :  { %2334 = vtanh.f32 %v2544_v24 }
 0x1e0   :  { %v2335_v36 = vpop.eup %2334 }
 0x1e1   :  { %148 = vrot.lane.b32.xlu1 %v2335_v36, %s2459_s30 }
 0x1e5   :  { %157 = vrot.lane.b32.xlu1 %v45_v37, %s2460_s7 }
 0x253   :  { %v149_v39 = vpop.permute.xlu1 %148 }
 0x254   :  { %v151_v40 = vmul.f32 %v2333_v18, %v149_v39 }
 0x256   :  { %153 = vrot.lane.b32.xlu0 %v151_v40, %s2460_s7 }
 0x257   :  { %v158_v41 = vpop.permute.xlu1 %157 }
 0x2c8   :  { %v154_v42 = vpop.permute.xlu0 %153 }
 0x2c9   :  { %v160_v43 = vsel %vm24_vm0, %v154_v42, %v158_v41  ;;  %1977 = vmatmul.mubr.msk.f32.vlgmr.msra.gmra.mrb[0].mxu0 %vm24_vm0, %v154_v42 }
 0x2ca   :  { %1966 = vmatmul.mubr.msk.f32.vlgmr.msra.gmra.mrb[2].mxu1 %vm167_vm2, %v160_v43  ;;  %2204 = vmatpush3.bf16.msra.mxu0 %v2556_v28 }
 0x2cb   :  { %2205 = vmatprep.subr.bf16.mxu0 %v2456_v0  ;;  %2216 = vmatpush3.bf16.msra.mxu1 %v2517_v5 }
 0x2cc   :  { %2217 = vmatprep.subr.bf16.mxu1 %v2456_v0  ;;  %2006 = vmatprep.mubr.msk.f32.mxu1 %vm2457_vm1, %v2458_v4 }
 0x2cd   :  { %1995 = vmatprep.mubr.msk.f32.mxu0 %vm2457_vm1, %v2458_v4 }
 0x2ce   :  { %2207 = vmatpush3.bf16.msra.mxu0 %v2562_v30 }
 0x2cf   :  { %2208 = vmatprep.subr.bf16.mxu0 %v2456_v0  ;;  %2219 = vmatpush3.bf16.msra.mxu1 %v2526_v7 }
 0x2d0   :  { %2220 = vmatprep.subr.bf16.mxu1 %v2456_v0 }
 0x2d2   :  { %2210 = vmatpush3.bf16.msra.mxu0 %v2572_v33 }
 0x2d3   :  { %2211 = vmatprep.subr.bf16.mxu0 %v2456_v0 }
 0x2d6   :  { %2213 = vmatpush3.bf16.msra.mxu0 %v2583_v38 }
 0x2d7   :  { %2232 = vmatprep.subr.bf16.mxu0 %v2456_v0 }
 0x39c   :  { %v344_v46 = vpop.f32.mrb[0].mxu0 }
 0x39d   :  { %v348_v47 = vadd.f32 %v1782_v44, %v344_v46  ;;  %v237_v48 = vpop.f32.mrb[2].mxu1  ;;  %v1978_v49 = vpop.f32.mrb[1].mxu0 }
 0x39e   :  { %v238_v50 = vadd.f32 %v2615_v45, %v237_v48  ;;  %v1967_v51 = vpop.f32.mrb[3].mxu1 }
 0x39f   :  { %2336 = vtanh.f32 %v348_v47  ;;  %v1784_v55 = vmul.f32 -1.442695, %v348_v47 }
 0x3a0   :  { %2338 = vtanh.f32 %v238_v50  ;;  %v1781_v56 = vmul.f32 -1.442695, %v238_v50 }
 0x3a1   :  { %2340 = vpow2.f32 %v1784_v55 }
 0x3a2   :  { %2342 = vpow2.f32 %v1781_v56 }
 0x3a9   :  { %v2337_v52 = vpop.eup %2336 }
 0x3aa   :  { %v2339_v53 = vpop.eup %2338  ;;  %358 = vrot.lane.b32.xlu1 %v2337_v52, %s2459_s30 }
 0x3ab   :  { %254 = vrot.lane.b32.xlu0 %v2339_v53, %s2459_s30  ;;  %v2341_v57 = vpop.eup %2340 }
 0x3ac   :  { %v2343_v58 = vpop.eup %2342  ;;  %v352_v59 = vadd.f32 1.0, %v2341_v57 }
 0x3ad   :  { %v244_v60 = vadd.f32 1.0, %v2343_v58 }
 0x3ae   :  { %2344 = vrcp.f32 %v352_v59 }
 0x3af   :  { %248 = vrot.lane.b32.xlu0 %v47_v54, %s2460_s7  ;;  %2346 = vrcp.f32 %v244_v60 }
 0x3b8   :  { %v2345_v61 = vpop.eup %2344 }
 0x3b9   :  { %v2347_v63 = vpop.eup %2346  ;;  %v355_v8 = vmul.f32 %v2345_v61, %v2544_v24 }
 0x41c   :  { %v359_v62 = vpop.permute.xlu1 %358 }
 0x41d   :  { %v361_v1 = vmul.f32 %v2345_v61, %v359_v62  ;;  %v255_v2 = vpop.permute.xlu0 %254 }
 0x41e   :  { %v257_v3 = vmul.f32 %v2347_v63, %v255_v2 }
 0x41f   :  { %363 = vrot.lane.b32.xlu0 %v361_v1, %s2460_s7  ;;  %v1794_v1 = vld [vmem:[%s2937_s0 + $0x18] sm:$0xff] }
 0x420   :  { %259 = vrot.lane.b32.xlu1 %v257_v3, %s2460_s7 }
 0x421   :  { %v249_v6 = vpop.permute.xlu0 %248 }
 0x422   :  { %v251_v9 = vmul.f32 %v2347_v63, %v249_v6 }
 0x491   :  { %v364_v10 = vpop.permute.xlu0 %363 }
 0x492   :  { %v2624_v11 = vadd.f32 %v364_v10, %v355_v8  ;;  %v260_v12 = vpop.permute.xlu1 %259 }
 0x493   :  { %v2626_v13 = vadd.f32 %v260_v12, %v251_v9 }
 0x494   :  { %2348 = vtanh.f32 %v2624_v11 }
 0x495   :  { %2350 = vtanh.f32 %v2626_v13 }
 0x49e   :  { %v2349_v14 = vpop.eup %2348 }
 0x49f   :  { %v2351_v15 = vpop.eup %2350  ;;  %369 = vrot.lane.b32.xlu0 %v2349_v14, %s2459_s30 }
 0x4a0   :  { %265 = vrot.lane.b32.xlu1 %v2351_v15, %s2459_s30 }
 0x511   :  { %v370_v16 = vpop.permute.xlu0 %369 }
 0x512   :  { %v372_v17 = vmul.f32 %v2345_v61, %v370_v16  ;;  %v266_v18 = vpop.permute.xlu1 %265 }
 0x513   :  { %v2632_v19 = vmul.f32 %v2347_v63, %v266_v18 }
 0x514   :  { %374 = vrot.lane.b32.xlu1 %v372_v17, %s2460_s7 }
 0x515   :  { %377 = vrot.lane.b32.xlu0 %v2632_v19, %s2459_s30 }
 0x586   :  { %v375_v20 = vpop.permute.xlu1 %374 }
 0x587   :  { %v378_v21 = vpop.permute.xlu0 %377  ;;  %2007 = vmatmul.mubr.msk.f32.vlgmr.msra.gmra.mrb[4].mxu1 %vm24_vm0, %v375_v20 }
 0x588   :  { %v380_v22 = vsel %vm24_vm0, %v375_v20, %v378_v21  ;;  %2222 = vmatpush3.bf16.msra.mxu1 %v2556_v28  ;;  %2025 = vmatprep.mubr.msk.f32.mxu1 %vm2457_vm1, %v2458_v4 }
 0x589   :  { %1996 = vmatmul.mubr.msk.f32.vlgmr.msra.gmra.mrb[2].mxu0 %vm167_vm2, %v380_v22  ;;  %2223 = vmatprep.subr.bf16.mxu1 %v2456_v0 }
 0x58a   :  { %2234 = vmatpush3.bf16.msra.mxu0 %v2517_v5  ;;  %2036 = vmatprep.mubr.msk.f32.mxu0 %vm2457_vm1, %v2458_v4 }
 0x58b   :  { %2235 = vmatprep.subr.bf16.mxu0 %v2456_v0 }
 0x58c   :  { %2225 = vmatpush3.bf16.msra.mxu1 %v2562_v30 }
 0x58d   :  { %2226 = vmatprep.subr.bf16.mxu1 %v2456_v0 }
 0x58e   :  { %2237 = vmatpush3.bf16.msra.mxu0 %v2526_v7 }
 0x58f   :  { %2238 = vmatprep.subr.bf16.mxu0 %v2456_v0 }
 0x590   :  { %2228 = vmatpush3.bf16.msra.mxu1 %v2572_v33 }
 0x591   :  { %2229 = vmatprep.subr.bf16.mxu1 %v2456_v0 }
 0x594   :  { %2231 = vmatpush3.bf16.msra.mxu1 %v2583_v38 }
 0x595   :  { %2250 = vmatprep.subr.bf16.mxu1 %v2456_v0 }
 0x65a   :  { %v554_v24 = vpop.f32.mrb[4].mxu1 }
 0x65b   :  { %v558_v25 = vadd.f32 %v1788_v23, %v554_v24  ;;  %v2008_v26 = vpop.f32.mrb[5].mxu1 }
 0x65c   :  { %v450_v27 = vpop.f32.mrb[2].mxu0 }
 0x65d   :  { %2352 = vtanh.f32 %v558_v25  ;;  %v451_v29 = vadd.f32 %v2615_v45, %v450_v27  ;;  %v1997_v31 = vpop.f32.mrb[3].mxu0  ;;  %v1790_v35 = vmul.f32 -1.442695, %v558_v25 }
 0x65f   :  { %2354 = vtanh.f32 %v451_v29  ;;  %v1786_v36 = vmul.f32 -1.442695, %v451_v29 }
 0x660   :  { %2356 = vpow2.f32 %v1790_v35 }
 0x661   :  { %2358 = vpow2.f32 %v1786_v36 }
 0x667   :  { %v2353_v32 = vpop.eup %2352 }
 0x668   :  { %568 = vrot.lane.b32.xlu0 %v2353_v32, %s2459_s30 }
 0x669   :  { %v2355_v34 = vpop.eup %2354 }
 0x66a   :  { %463 = vrot.lane.b32.xlu1 %v2355_v34, %s2459_s30  ;;  %v2357_v37 = vpop.eup %2356 }
 0x66b   :  { %v2359_v39 = vpop.eup %2358  ;;  %v562_v40 = vadd.f32 1.0, %v2357_v37 }
 0x66c   :  { %v457_v41 = vadd.f32 1.0, %v2359_v39 }
 0x66d   :  { %2360 = vrcp.f32 %v562_v40 }
 0x66e   :  { %2362 = vrcp.f32 %v457_v41 }
 0x677   :  { %v2361_v42 = vpop.eup %2360 }
 0x678   :  { %v2363_v46 = vpop.eup %2362  ;;  %v565_v49 = vmul.f32 %v2361_v42, %v2624_v11 }
 0x679   :  { %v460_v52 = vmul.f32 %v2363_v46, %v2626_v13 }
 0x6da   :  { %v569_v43 = vpop.permute.xlu0 %568 }
 0x6db   :  { %v571_v44 = vmul.f32 %v2361_v42, %v569_v43 }
 0x6dc   :  { %v464_v47 = vpop.permute.xlu1 %463 }
 0x6dd   :  { %573 = vrot.lane.b32.xlu0 %v571_v44, %s2460_s7  ;;  %v466_v48 = vmul.f32 %v2363_v46, %v464_v47 }
 0x6df   :  { %468 = vrot.lane.b32.xlu1 %v466_v48, %s2460_s7 }
 0x74f   :  { %v574_v50 = vpop.permute.xlu0 %573 }
 0x750   :  { %v2665_v51 = vadd.f32 %v574_v50, %v565_v49 }
 0x751   :  { %v469_v53 = vpop.permute.xlu1 %468 }
 0x752   :  { %2364 = vtanh.f32 %v2665_v51  ;;  %v2669_v54 = vadd.f32 %v469_v53, %v460_v52 }
 0x754   :  { %2366 = vtanh.f32 %v2669_v54 }
 0x75c   :  { %v2365_v55 = vpop.eup %2364 }
 0x75d   :  { %579 = vrot.lane.b32.xlu0 %v2365_v55, %s2459_s30 }
 0x75e   :  { %v2367_v56 = vpop.eup %2366 }
 0x75f   :  { %474 = vrot.lane.b32.xlu1 %v2367_v56, %s2459_s30 }
 0x7cf   :  { %v580_v57 = vpop.permute.xlu0 %579 }
 0x7d0   :  { %v582_v58 = vmul.f32 %v2361_v42, %v580_v57 }
 0x7d1   :  { %v475_v59 = vpop.permute.xlu1 %474 }
 0x7d2   :  { %584 = vrot.lane.b32.xlu1 %v582_v58, %s2460_s7  ;;  %v2675_v60 = vmul.f32 %v2363_v46, %v475_v59  ;;  %v1800_v46 = vld [vmem:[%s2937_s0 + $0x20] sm:$0xff] }
 0x7d4   :  { %587 = vrot.lane.b32.xlu0 %v2675_v60, %s2459_s30 }
 0x844   :  { %v585_v61 = vpop.permute.xlu1 %584 }
 0x845   :  { %2037 = vmatmul.mubr.msk.f32.vlgmr.msra.gmra.mrb[4].mxu0 %vm24_vm0, %v585_v61 }
 0x846   :  { %2240 = vmatpush3.bf16.msra.mxu0 %v2556_v28  ;;  %2055 = vmatprep.mubr.msk.f32.mxu0 %vm2457_vm1, %v2458_v4  ;;  %v588_v62 = vpop.permute.xlu0 %587 }
 0x847   :  { %2241 = vmatprep.subr.bf16.mxu0 %v2456_v0  ;;  %v590_v63 = vsel %vm24_vm0, %v585_v61, %v588_v62 }
 0x848   :  { %2026 = vmatmul.mubr.msk.f32.vlgmr.msra.gmra.mrb[6].mxu1 %vm167_vm2, %v590_v63 }
 0x849   :  { %2252 = vmatpush3.bf16.msra.mxu1 %v2517_v5  ;;  %2066 = vmatprep.mubr.msk.f32.mxu1 %vm2457_vm1, %v2458_v4 }
 0x84a   :  { %2243 = vmatpush3.bf16.msra.mxu0 %v2562_v30  ;;  %2253 = vmatprep.subr.bf16.mxu1 %v2456_v0 }
 0x84b   :  { %2244 = vmatprep.subr.bf16.mxu0 %v2456_v0 }
 0x84d   :  { %2255 = vmatpush3.bf16.msra.mxu1 %v2526_v7 }
 0x84e   :  { %2246 = vmatpush3.bf16.msra.mxu0 %v2572_v33  ;;  %2256 = vmatprep.subr.bf16.mxu1 %v2456_v0 }
 0x84f   :  { %2247 = vmatprep.subr.bf16.mxu0 %v2456_v0 }
 0x852   :  { %2249 = vmatpush3.bf16.msra.mxu0 %v2583_v38 }
 0x853   :  { %2268 = vmatprep.subr.bf16.mxu0 %v2456_v0 }
 0x918   :  { %v764_v2 = vpop.f32.mrb[4].mxu0 }
 0x919   :  { %v768_v3 = vadd.f32 %v1794_v1, %v764_v2  ;;  %v2038_v6 = vpop.f32.mrb[5].mxu0 }
 0x91b   :  { %2368 = vtanh.f32 %v768_v3  ;;  %v660_v8 = vpop.f32.mrb[6].mxu1  ;;  %v1796_v13 = vmul.f32 -1.442695, %v768_v3 }
 0x91c   :  { %v661_v9 = vadd.f32 %v2615_v45, %v660_v8  ;;  %v2027_v10 = vpop.f32.mrb[7].mxu1 }
 0x91e   :  { %2370 = vtanh.f32 %v661_v9  ;;  %v1792_v14 = vmul.f32 -1.442695, %v661_v9 }
 0x91f   :  { %2372 = vpow2.f32 %v1796_v13 }
 0x920   :  { %2374 = vpow2.f32 %v1792_v14 }
 0x925   :  { %v2369_v11 = vpop.eup %2368 }
 0x926   :  { %778 = vrot.lane.b32.xlu0 %v2369_v11, %s2459_s30 }
 0x928   :  { %v2371_v12 = vpop.eup %2370 }
 0x929   :  { %673 = vrot.lane.b32.xlu1 %v2371_v12, %s2459_s30  ;;  %v2373_v15 = vpop.eup %2372 }
 0x92a   :  { %v772_v16 = vadd.f32 1.0, %v2373_v15  ;;  %v2375_v17 = vpop.eup %2374 }
 0x92b   :  { %v667_v18 = vadd.f32 1.0, %v2375_v17 }
 0x92c   :  { %2376 = vrcp.f32 %v772_v16 }
 0x92d   :  { %2378 = vrcp.f32 %v667_v18 }
 0x936   :  { %v2377_v20 = vpop.eup %2376 }
 0x937   :  { %v2379_v23 = vpop.eup %2378  ;;  %v775_v26 = vmul.f32 %v2377_v20, %v2665_v51 }
 0x938   :  { %v670_v31 = vmul.f32 %v2379_v23, %v2669_v54 }
 0x998   :  { %v779_v21 = vpop.permute.xlu0 %778 }
 0x999   :  { %v781_v22 = vmul.f32 %v2377_v20, %v779_v21 }
 0x99b   :  { %783 = vrot.lane.b32.xlu0 %v781_v22, %s2460_s7  ;;  %v674_v24 = vpop.permute.xlu1 %673 }
 0x99c   :  { %v676_v25 = vmul.f32 %v2379_v23, %v674_v24  ;;  %v1806_v24 = vld [vmem:[%s2937_s0 + $0x28] sm:$0xff] }
 0x99e   :  { %678 = vrot.lane.b32.xlu1 %v676_v25, %s2460_s7 }
 0xa0d   :  { %v784_v27 = vpop.permute.xlu0 %783 }
 0xa0e   :  { %v2707_v29 = vadd.f32 %v784_v27, %v775_v26 }
 0xa10   :  { %2380 = vtanh.f32 %v2707_v29  ;;  %v679_v32 = vpop.permute.xlu1 %678 }
 0xa11   :  { %v2711_v34 = vadd.f32 %v679_v32, %v670_v31 }
 0xa13   :  { %2382 = vtanh.f32 %v2711_v34 }
 0xa1a   :  { %v2381_v35 = vpop.eup %2380 }
 0xa1b   :  { %789 = vrot.lane.b32.xlu0 %v2381_v35, %s2459_s30 }
 0xa1d   :  { %v2383_v36 = vpop.eup %2382 }
 0xa1e   :  { %684 = vrot.lane.b32.xlu1 %v2383_v36, %s2459_s30 }
 0xa8d   :  { %v790_v37 = vpop.permute.xlu0 %789 }
 0xa8e   :  { %v792_v39 = vmul.f32 %v2377_v20, %v790_v37 }
 0xa90   :  { %794 = vrot.lane.b32.xlu1 %v792_v39, %s2460_s7  ;;  %v685_v40 = vpop.permute.xlu1 %684 }
 0xa91   :  { %v2717_v41 = vmul.f32 %v2379_v23, %v685_v40 }
 0xa93   :  { %797 = vrot.lane.b32.xlu0 %v2717_v41, %s2459_s30 }
 0xb02   :  { %v795_v42 = vpop.permute.xlu1 %794 }
 0xb03   :  { %2067 = vmatmul.mubr.msk.f32.vlgmr.msra.gmra.mrb[8].mxu1 %vm24_vm0, %v795_v42 }
 0xb04   :  { %2258 = vmatpush3.bf16.msra.mxu1 %v2556_v28  ;;  %2085 = vmatprep.mubr.msk.f32.mxu1 %vm2457_vm1, %v2458_v4 }
 0xb05   :  { %2259 = vmatprep.subr.bf16.mxu1 %v2456_v0  ;;  %v798_v43 = vpop.permute.xlu0 %797 }
 0xb06   :  { %v800_v44 = vsel %vm24_vm0, %v795_v42, %v798_v43 }
 0xb07   :  { %2056 = vmatmul.mubr.msk.f32.vlgmr.msra.gmra.mrb[6].mxu0 %vm167_vm2, %v800_v44 }
 0xb08   :  { %2261 = vmatpush3.bf16.msra.mxu1 %v2562_v30  ;;  %2270 = vmatpush3.bf16.msra.mxu0 %v2517_v5 }
 0xb09   :  { %2262 = vmatprep.subr.bf16.mxu1 %v2456_v0  ;;  %2271 = vmatprep.subr.bf16.mxu0 %v2456_v0 }
 0xb0a   :  { %2096 = vmatprep.mubr.msk.f32.mxu0 %vm2457_vm1, %v2458_v4 }
 0xb0c   :  { %2264 = vmatpush3.bf16.msra.mxu1 %v2572_v33  ;;  %2273 = vmatpush3.bf16.msra.mxu0 %v2526_v7 }
 0xb0d   :  { %2265 = vmatprep.subr.bf16.mxu1 %v2456_v0  ;;  %2274 = vmatprep.subr.bf16.mxu0 %v2456_v0 }
 0xb10   :  { %2267 = vmatpush3.bf16.msra.mxu1 %v2583_v38 }
 0xb11   :  { %2286 = vmatprep.subr.bf16.mxu1 %v2456_v0 }
 0xbd6   :  { %v974_v47 = vpop.f32.mrb[8].mxu1 }
 0xbd7   :  { %v978_v48 = vadd.f32 %v1800_v46, %v974_v47  ;;  %v2068_v49 = vpop.f32.mrb[9].mxu1 }
 0xbd9   :  { %2384 = vtanh.f32 %v978_v48  ;;  %v1802_v55 = vmul.f32 -1.442695, %v978_v48 }
 0xbda   :  { %v870_v50 = vpop.f32.mrb[6].mxu0 }
 0xbdb   :  { %v871_v51 = vadd.f32 %v2615_v45, %v870_v50  ;;  %v2057_v52 = vpop.f32.mrb[7].mxu0 }
 0xbdd   :  { %2386 = vtanh.f32 %v871_v51  ;;  %v1798_v56 = vmul.f32 -1.442695, %v871_v51 }
 0xbde   :  { %2388 = vpow2.f32 %v1802_v55 }
 0xbdf   :  { %2390 = vpow2.f32 %v1798_v56 }
 0xbe3   :  { %v2385_v53 = vpop.eup %2384 }
 0xbe4   :  { %988 = vrot.lane.b32.xlu0 %v2385_v53, %s2459_s30 }
 0xbe7   :  { %v2387_v54 = vpop.eup %2386 }
 0xbe8   :  { %883 = vrot.lane.b32.xlu1 %v2387_v54, %s2459_s30  ;;  %v2389_v57 = vpop.eup %2388 }
 0xbe9   :  { %v982_v58 = vadd.f32 1.0, %v2389_v57  ;;  %v2391_v59 = vpop.eup %2390 }
 0xbea   :  { %v877_v61 = vadd.f32 1.0, %v2391_v59 }
 0xbeb   :  { %2392 = vrcp.f32 %v982_v58 }
 0xbec   :  { %2394 = vrcp.f32 %v877_v61 }
 0xbf5   :  { %v2393_v62 = vpop.eup %2392 }
 0xbf6   :  { %v2395_v2 = vpop.eup %2394  ;;  %v985_v8 = vmul.f32 %v2393_v62, %v2707_v29 }
 0xbf7   :  { %v880_v11 = vmul.f32 %v2395_v2, %v2711_v34 }
 0xc56   :  { %v989_v63 = vpop.permute.xlu0 %988 }
 0xc57   :  { %v991_v1 = vmul.f32 %v2393_v62, %v989_v63 }
 0xc59   :  { %993 = vrot.lane.b32.xlu0 %v991_v1, %s2460_s7 }
 0xc5a   :  { %v884_v3 = vpop.permute.xlu1 %883 }
 0xc5b   :  { %v886_v6 = vmul.f32 %v2395_v2, %v884_v3 }
 0xc5d   :  { %888 = vrot.lane.b32.xlu1 %v886_v6, %s2460_s7  ;;  %v1812_v6 = vld [vmem:[%s2937_s0 + $0x30] sm:$0xff] }
 0xccb   :  { %v994_v9 = vpop.permute.xlu0 %993 }
 0xccc   :  { %v2749_v10 = vadd.f32 %v994_v9, %v985_v8 }
 0xcce   :  { %2396 = vtanh.f32 %v2749_v10 }
 0xccf   :  { %v889_v12 = vpop.permute.xlu1 %888 }
 0xcd0   :  { %v2753_v13 = vadd.f32 %v889_v12, %v880_v11 }
 0xcd2   :  { %2398 = vtanh.f32 %v2753_v13 }
 0xcd8   :  { %v2397_v14 = vpop.eup %2396 }
 0xcd9   :  { %999 = vrot.lane.b32.xlu0 %v2397_v14, %s2459_s30 }
 0xcdc   :  { %v2399_v15 = vpop.eup %2398 }
 0xcdd   :  { %894 = vrot.lane.b32.xlu1 %v2399_v15, %s2459_s30 }
 0xd4b   :  { %v1000_v16 = vpop.permute.xlu0 %999 }
 0xd4c   :  { %v1002_v17 = vmul.f32 %v2393_v62, %v1000_v16 }
 0xd4e   :  { %1004 = vrot.lane.b32.xlu1 %v1002_v17, %s2460_s7 }
 0xd4f   :  { %v895_v18 = vpop.permute.xlu1 %894 }
 0xd50   :  { %v2759_v20 = vmul.f32 %v2395_v2, %v895_v18 }
 0xd52   :  { %1007 = vrot.lane.b32.xlu0 %v2759_v20, %s2459_s30 }
 0xdc0   :  { %v1005_v21 = vpop.permute.xlu1 %1004 }
 0xdc1   :  { %2097 = vmatmul.mubr.msk.f32.vlgmr.msra.gmra.mrb[8].mxu0 %vm24_vm0, %v1005_v21 }
 0xdc2   :  { %2276 = vmatpush3.bf16.msra.mxu0 %v2556_v28  ;;  %2115 = vmatprep.mubr.msk.f32.mxu0 %vm2457_vm1, %v2458_v4 }
 0xdc3   :  { %2277 = vmatprep.subr.bf16.mxu0 %v2456_v0 }
 0xdc4   :  { %v1008_v22 = vpop.permute.xlu0 %1007 }
 0xdc5   :  { %v1010_v23 = vsel %vm24_vm0, %v1005_v21, %v1008_v22 }
 0xdc6   :  { %2279 = vmatpush3.bf16.msra.mxu0 %v2562_v30  ;;  %2086 = vmatmul.mubr.msk.f32.vlgmr.msra.gmra.mrb[10].mxu1 %vm167_vm2, %v1010_v23 }
 0xdc7   :  { %2280 = vmatprep.subr.bf16.mxu0 %v2456_v0  ;;  %2288 = vmatpush3.bf16.msra.mxu1 %v2517_v5 }
 0xdc8   :  { %2126 = vmatprep.mubr.msk.f32.mxu1 %vm2457_vm1, %v2458_v4  ;;  %2289 = vmatprep.subr.bf16.mxu1 %v2456_v0 }
 0xdca   :  { %2282 = vmatpush3.bf16.msra.mxu0 %v2572_v33 }
 0xdcb   :  { %2283 = vmatprep.subr.bf16.mxu0 %v2456_v0  ;;  %2291 = vmatpush3.bf16.msra.mxu1 %v2526_v7 }
 0xdcc   :  { %2292 = vmatprep.subr.bf16.mxu1 %v2456_v0 }
 0xdce   :  { %2285 = vmatpush3.bf16.msra.mxu0 %v2583_v38 }
 0xdcf   :  { %2304 = vmatprep.subr.bf16.mxu0 %v2456_v0 }
 0xe94   :  { %v1184_v25 = vpop.f32.mrb[8].mxu0 }
 0xe95   :  { %v1188_v26 = vadd.f32 %v1806_v24, %v1184_v25  ;;  %v2098_v27 = vpop.f32.mrb[9].mxu0 }
 0xe97   :  { %2400 = vtanh.f32 %v1188_v26  ;;  %v1808_v36 = vmul.f32 -1.442695, %v1188_v26 }
 0xe99   :  { %v1080_v29 = vpop.f32.mrb[10].mxu1 }
 0xe9a   :  { %v1081_v31 = vadd.f32 %v2615_v45, %v1080_v29  ;;  %v2087_v32 = vpop.f32.mrb[11].mxu1 }
 0xe9c   :  { %2402 = vtanh.f32 %v1081_v31  ;;  %v1804_v37 = vmul.f32 -1.442695, %v1081_v31 }
 0xe9d   :  { %2404 = vpow2.f32 %v1808_v36 }
 0xe9e   :  { %2406 = vpow2.f32 %v1804_v37 }
 0xea1   :  { %v2401_v34 = vpop.eup %2400 }
 0xea2   :  { %1198 = vrot.lane.b32.xlu0 %v2401_v34, %s2459_s30 }
 0xea6   :  { %v2403_v35 = vpop.eup %2402 }
 0xea7   :  { %1093 = vrot.lane.b32.xlu1 %v2403_v35, %s2459_s30  ;;  %v2405_v39 = vpop.eup %2404 }
 0xea8   :  { %v1192_v40 = vadd.f32 1.0, %v2405_v39  ;;  %v2407_v42 = vpop.eup %2406 }
 0xea9   :  { %v1087_v43 = vadd.f32 1.0, %v2407_v42 }
 0xeaa   :  { %2408 = vrcp.f32 %v1192_v40 }
 0xeab   :  { %2410 = vrcp.f32 %v1087_v43 }
 0xeb4   :  { %v2409_v44 = vpop.eup %2408 }
 0xeb5   :  { %v2411_v48 = vpop.eup %2410  ;;  %v1195_v51 = vmul.f32 %v2409_v44, %v2749_v10 }
 0xeb6   :  { %v1090_v54 = vmul.f32 %v2411_v48, %v2753_v13 }
 0xf14   :  { %v1199_v46 = vpop.permute.xlu0 %1198 }
 0xf15   :  { %v1201_v47 = vmul.f32 %v2409_v44, %v1199_v46 }
 0xf17   :  { %1203 = vrot.lane.b32.xlu0 %v1201_v47, %s2460_s7 }
 0xf19   :  { %v1094_v49 = vpop.permute.xlu1 %1093 }
 0xf1a   :  { %v1096_v50 = vmul.f32 %v2411_v48, %v1094_v49 }
 0xf1c   :  { %1098 = vrot.lane.b32.xlu1 %v1096_v50, %s2460_s7 }
 0xf89   :  { %v1204_v52 = vpop.permute.xlu0 %1203 }
 0xf8a   :  { %v2791_v53 = vadd.f32 %v1204_v52, %v1195_v51 }
 0xf8c   :  { %2412 = vtanh.f32 %v2791_v53 }
 0xf8e   :  { %v1099_v55 = vpop.permute.xlu1 %1098 }
 0xf8f   :  { %v2795_v56 = vadd.f32 %v1099_v55, %v1090_v54 }
 0xf91   :  { %2414 = vtanh.f32 %v2795_v56 }
 0xf96   :  { %v2413_v57 = vpop.eup %2412 }
 0xf97   :  { %1209 = vrot.lane.b32.xlu0 %v2413_v57, %s2459_s30 }
 0xf9b   :  { %v2415_v58 = vpop.eup %2414 }
 0xf9c   :  { %1104 = vrot.lane.b32.xlu1 %v2415_v58, %s2459_s30 }
0x1009   :  { %v1210_v59 = vpop.permute.xlu0 %1209 }
0x100a   :  { %v1212_v61 = vmul.f32 %v2409_v44, %v1210_v59 }
0x100c   :  { %1214 = vrot.lane.b32.xlu1 %v1212_v61, %s2460_s7 }
0x100e   :  { %v1105_v62 = vpop.permute.xlu1 %1104 }
0x100f   :  { %v2801_v63 = vmul.f32 %v2411_v48, %v1105_v62 }
0x1011   :  { %1217 = vrot.lane.b32.xlu0 %v2801_v63, %s2459_s30 }
0x107e   :  { %v1215_v1 = vpop.permute.xlu1 %1214 }
0x107f   :  { %2127 = vmatmul.mubr.msk.f32.vlgmr.msra.gmra.mrb[12].mxu1 %vm24_vm0, %v1215_v1 }
0x1080   :  { %2294 = vmatpush3.bf16.msra.mxu1 %v2556_v28  ;;  %2145 = vmatprep.mubr.msk.f32.mxu1 %vm2457_vm1, %v2458_v4 }
0x1081   :  { %2295 = vmatprep.subr.bf16.mxu1 %v2456_v0 }
0x1083   :  { %v1218_v2 = vpop.permute.xlu0 %1217 }
0x1084   :  { %2297 = vmatpush3.bf16.msra.mxu1 %v2562_v30  ;;  %v1220_v3 = vsel %vm24_vm0, %v1215_v1, %v1218_v2 }
0x1085   :  { %2298 = vmatprep.subr.bf16.mxu1 %v2456_v0  ;;  %2116 = vmatmul.mubr.msk.f32.vlgmr.msra.gmra.mrb[10].mxu0 %vm167_vm2, %v1220_v3 }
0x1086   :  { %2306 = vmatpush3.bf16.msra.mxu0 %v2517_v5  ;;  %2156 = vmatprep.mubr.msk.f32.mxu0 %vm2457_vm1, %v2458_v4 }
0x1087   :  { %2307 = vmatprep.subr.bf16.mxu0 %v2456_v0 }
0x1088   :  { %2300 = vmatpush3.bf16.msra.mxu1 %v2572_v33 }
0x1089   :  { %2301 = vmatprep.subr.bf16.mxu1 %v2456_v0 }
0x108a   :  { %2309 = vmatpush3.bf16.msra.mxu0 %v2526_v7 }
0x108b   :  { %2310 = vmatprep.subr.bf16.mxu0 %v2456_v0 }
0x108c   :  { %2303 = vmatpush3.bf16.msra.mxu1 %v2583_v38 }
0x1152   :  { %v1394_v5 = vpop.f32.mrb[12].mxu1 }
0x1153   :  { %v1398_v8 = vadd.f32 %v1812_v6, %v1394_v5  ;;  %v2128_v9 = vpop.f32.mrb[13].mxu1 }
0x1155   :  { %2416 = vtanh.f32 %v1398_v8  ;;  %v1814_v14 = vmul.f32 -1.442695, %v1398_v8 }
0x1158   :  { %v1290_v10 = vpop.f32.mrb[10].mxu0 }
0x1159   :  { %v1291_v11 = vadd.f32 %v2615_v45, %v1290_v10  ;;  %v2117_v12 = vpop.f32.mrb[11].mxu0 }
0x115b   :  { %2418 = vtanh.f32 %v1291_v11  ;;  %v1810_v15 = vmul.f32 -1.442695, %v1291_v11 }
0x115c   :  { %2420 = vpow2.f32 %v1814_v14 }
0x115d   :  { %2422 = vpow2.f32 %v1810_v15 }
0x115f   :  { %v2417_v13 = vpop.eup %2416 }
0x1160   :  { %1408 = vrot.lane.b32.xlu0 %v2417_v13, %s2459_s30 }
0x1165   :  { %v2419_v7 = vpop.eup %2418 }
0x1166   :  { %1303 = vrot.lane.b32.xlu1 %v2419_v7, %s2459_s30  ;;  %v2421_v16 = vpop.eup %2420 }
0x1167   :  { %v1402_v17 = vadd.f32 1.0, %v2421_v16  ;;  %v2423_v18 = vpop.eup %2422 }
0x1168   :  { %v1297_v21 = vadd.f32 1.0, %v2423_v18 }
0x1169   :  { %2424 = vrcp.f32 %v1402_v17 }
0x116a   :  { %2426 = vrcp.f32 %v1297_v21 }
0x1173   :  { %v2425_v22 = vpop.eup %2424 }
0x1174   :  { %v2427_v25 = vpop.eup %2426  ;;  %v1405_v29 = vmul.f32 %v2425_v22, %v2791_v53 }
0x1175   :  { %v1300_v34 = vmul.f32 %v2427_v25, %v2795_v56 }
0x11d2   :  { %v1409_v23 = vpop.permute.xlu0 %1408 }
0x11d3   :  { %v1411_v24 = vmul.f32 %v2425_v22, %v1409_v23 }
0x11d5   :  { %1413 = vrot.lane.b32.xlu0 %v1411_v24, %s2460_s7 }
0x11d8   :  { %v1304_v26 = vpop.permute.xlu1 %1303 }
0x11d9   :  { %v1306_v27 = vmul.f32 %v2427_v25, %v1304_v26 }
0x11db   :  { %1308 = vrot.lane.b32.xlu1 %v1306_v27, %s2460_s7 }
0x1247   :  { %v1414_v31 = vpop.permute.xlu0 %1413 }
0x1248   :  { %v1416_v32 = vadd.f32 %v1414_v31, %v1405_v29 }
0x124a   :  { %2428 = vtanh.f32 %v1416_v32 }
0x124d   :  { %v1309_v35 = vpop.permute.xlu1 %1308 }
0x124e   :  { %v1311_v36 = vadd.f32 %v1309_v35, %v1300_v34 }
0x1250   :  { %2430 = vtanh.f32 %v1311_v36 }
0x1254   :  { %v2429_v37 = vpop.eup %2428 }
0x1255   :  { %1419 = vrot.lane.b32.xlu0 %v2429_v37, %s2459_s30 }
0x125a   :  { %v2431_v39 = vpop.eup %2430 }
0x125b   :  { %1314 = vrot.lane.b32.xlu1 %v2431_v39, %s2459_s30 }
0x12c7   :  { %v1420_v40 = vpop.permute.xlu0 %1419 }
0x12c8   :  { %v1422_v42 = vmul.f32 %v2425_v22, %v1420_v40 }
0x12ca   :  { %1424 = vrot.lane.b32.xlu1 %v1422_v42, %s2460_s7 }
0x12cd   :  { %v1315_v43 = vpop.permute.xlu1 %1314 }
0x12ce   :  { %v2836_v44 = vmul.f32 %v2427_v25, %v1315_v43 }
0x12d0   :  { %1427 = vrot.lane.b32.xlu0 %v2836_v44, %s2459_s30 }
0x133c   :  { %v1425_v46 = vpop.permute.xlu1 %1424 }
0x133d   :  { %2157 = vmatmul.mubr.msk.f32.vlgmr.msra.gmra.mrb[12].mxu0 %vm24_vm0, %v1425_v46 }
0x133e   :  { %2312 = vmatpush3.bf16.msra.mxu0 %v2556_v28  ;;  %2175 = vmatprep.mubr.msk.f32.mxu0 %vm2457_vm1, %v2458_v4  ;;  %v1818_v4 = vld [vmem:[%s2937_s0 + $0x38] sm:$0xff] }
0x133f   :  { %2313 = vmatprep.subr.bf16.mxu0 %v2456_v0 }
0x1342   :  { %2315 = vmatpush3.bf16.msra.mxu0 %v2562_v30  ;;  %v1428_v47 = vpop.permute.xlu0 %1427 }
0x1343   :  { %2316 = vmatprep.subr.bf16.mxu0 %v2456_v0  ;;  %v1430_v48 = vsel %vm24_vm0, %v1425_v46, %v1428_v47 }
0x1344   :  { %2146 = vmatmul.mubr.msk.f32.vlgmr.msra.gmra.mrb[14].mxu1 %vm167_vm2, %v1430_v48 }
0x1346   :  { %2318 = vmatpush3.bf16.msra.mxu0 %v2572_v33 }
0x1347   :  { %2319 = vmatprep.subr.bf16.mxu0 %v2456_v0 }
0x134a   :  { %2321 = vmatpush3.bf16.msra.mxu0 %v2583_v38 }
0x1410   :  { %v1604_v28 = vpop.f32.mrb[12].mxu0 }
0x1411   :  { %v1608_v49 = vadd.f32 %v1818_v4, %v1604_v28  ;;  %v2158_v30 = vpop.f32.mrb[13].mxu0 }
0x1413   :  { %2432 = vtanh.f32 %v1608_v49  ;;  %v1820_v0 = vmul.f32 -1.442695, %v1608_v49 }
0x1417   :  { %v1500_v50 = vpop.f32.mrb[14].mxu1 }
0x1418   :  { %v1501_v51 = vadd.f32 %v2615_v45, %v1500_v50  ;;  %v2147_v52 = vpop.f32.mrb[15].mxu1 }
0x141a   :  { %2434 = vtanh.f32 %v1501_v51  ;;  %v1816_v38 = vmul.f32 -1.442695, %v1501_v51 }
0x141b   :  { %2436 = vpow2.f32 %v1820_v0 }
0x141c   :  { %2438 = vpow2.f32 %v1816_v38 }
0x141d   :  { %v2433_v53 = vpop.eup %2432 }
0x141e   :  { %1618 = vrot.lane.b32.xlu0 %v2433_v53, %s2459_s30 }
0x1424   :  { %v2435_v33 = vpop.eup %2434 }
0x1425   :  { %1513 = vrot.lane.b32.xlu1 %v2435_v33, %s2459_s30  ;;  %v2437_v54 = vpop.eup %2436 }
0x1426   :  { %v1612_v55 = vadd.f32 1.0, %v2437_v54  ;;  %v2439_v56 = vpop.eup %2438 }
0x1427   :  { %v1507_v57 = vadd.f32 1.0, %v2439_v56 }
0x1428   :  { %2440 = vrcp.f32 %v1612_v55 }
0x1429   :  { %2442 = vrcp.f32 %v1507_v57 }
0x1432   :  { %v2441_v58 = vpop.eup %2440 }
0x1433   :  { %v2443_v62 = vpop.eup %2442  ;;  %v1615_v3 = vmul.f32 %v2441_v58, %v1416_v32 }
0x1434   :  { %v1510_v8 = vmul.f32 %v2443_v62, %v1311_v36 }
0x1490   :  { %v1619_v59 = vpop.permute.xlu0 %1618 }
0x1491   :  { %v1621_v61 = vmul.f32 %v2441_v58, %v1619_v59 }
0x1493   :  { %1623 = vrot.lane.b32.xlu0 %v1621_v61, %s2460_s7 }
0x1497   :  { %v1514_v1 = vpop.permute.xlu1 %1513 }
0x1498   :  { %v1516_v2 = vmul.f32 %v2443_v62, %v1514_v1 }
0x149a   :  { %1518 = vrot.lane.b32.xlu1 %v1516_v2, %s2460_s7 }
0x1505   :  { %v1624_v6 = vpop.permute.xlu0 %1623 }
0x1506   :  { %v1626_v5 = vadd.f32 %v1624_v6, %v1615_v3 }
0x1508   :  { %2444 = vtanh.f32 %v1626_v5 }
0x150c   :  { %v1519_v9 = vpop.permute.xlu1 %1518 }
0x150d   :  { %v1521_v10 = vadd.f32 %v1519_v9, %v1510_v8 }
0x150f   :  { %2446 = vtanh.f32 %v1521_v10 }
0x1512   :  { %v2445_v11 = vpop.eup %2444 }
0x1513   :  { %1629 = vrot.lane.b32.xlu0 %v2445_v11, %s2459_s30 }
0x1519   :  { %v2447_v12 = vpop.eup %2446 }
0x151a   :  { %1524 = vrot.lane.b32.xlu1 %v2447_v12, %s2459_s30 }
0x1585   :  { %v1630_v13 = vpop.permute.xlu0 %1629 }
0x1586   :  { %v1632_v7 = vmul.f32 %v2441_v58, %v1630_v13 }
0x1588   :  { %1634 = vrot.lane.b32.xlu1 %v1632_v7, %s2460_s7 }
0x158c   :  { %v1525_v14 = vpop.permute.xlu1 %1524 }
0x158d   :  { %v1527_v15 = vmul.f32 %v2443_v62, %v1525_v14 }
0x158f   :  { %1637 = vrot.lane.b32.xlu0 %v1527_v15, %s2459_s30 }
0x15fa   :  { %v1635_v16 = vpop.permute.xlu1 %1634 }
0x15fb   :  { %1744 = vst.msk [vmem:[#allocation2] sm:$0xff] %vm24_vm0, %v1635_v16  ;;  %1759 = vst.msk [vmem:[%s2940_s5] sm:$0xff] %vm24_vm0, %v1635_v16 }
0x1601   :  { %v1638_v17 = vpop.permute.xlu0 %1637 }
0x1602   :  { %v1640_v18 = vsel %vm24_vm0, %v1635_v16, %v1638_v17 }
0x1603   :  { %2176 = vmatmul.mubr.msk.f32.vlgmr.msra.gmra.mrb[14].mxu0 %vm167_vm2, %v1640_v18 }
0x16d6   :  { %v1710_v21 = vpop.f32.mrb[14].mxu0 }
0x16d7   :  { %v1711_v22 = vadd.f32 %v2615_v45, %v1710_v21  ;;  %v2177_v23 = vpop.f32.mrb[15].mxu0 }
0x16d9   :  { %2448 = vtanh.f32 %v1711_v22  ;;  %v1822_v25 = vmul.f32 -1.442695, %v1711_v22 }
0x16db   :  { %2450 = vpow2.f32 %v1822_v25 }
0x16e3   :  { %v2449_v24 = vpop.eup %2448 }
0x16e4   :  { %1723 = vrot.lane.b32.xlu1 %v2449_v24, %s2459_s30 }
0x16e5   :  { %v2451_v26 = vpop.eup %2450 }
0x16e6   :  { %v1717_v27 = vadd.f32 1.0, %v2451_v26 }
0x16e8   :  { %2452 = vrcp.f32 %v1717_v27 }
0x16f2   :  { %v2453_v29 = vpop.eup %2452 }
0x16f3   :  { %v1720_v45 = vmul.f32 %v2453_v29, %v1521_v10 }
0x1756   :  { %v1724_v31 = vpop.permute.xlu1 %1723 }
0x1757   :  { %v1726_v32 = vmul.f32 %v2453_v29, %v1724_v31 }
0x1759   :  { %1728 = vrot.lane.b32.xlu0 %v1726_v32, %s2460_s7 }
0x175d   :  { %270 = vrot.lane.b32.xlu0 %v2632_v19, %s2460_s7 }
0x1761   :  { %689 = vrot.lane.b32.xlu0 %v2717_v41, %s2460_s7 }
0x1765   :  { %1109 = vrot.lane.b32.xlu0 %v2801_v63, %s2460_s7 }
0x1769   :  { %1529 = vrot.lane.b32.xlu0 %v1527_v15, %s2460_s7 }
0x176d   :  { %1746 = vrot.lane.b32.xlu0 %v1626_v5, %s2461_s16 }
0x17cb   :  { %v1729_v34 = vpop.permute.xlu0 %1728 }
0x17cc   :  { %v1731_v35 = vadd.f32 %v1729_v34, %v1720_v45 }
0x17ce   :  { %2454 = vtanh.f32 %v1731_v35 }
0x17cf   :  { %v271_v36 = vpop.permute.xlu0 %270 }
0x17d0   :  { %273 = vst.msk [vmem:[%s2941_s4] sm:$0xff] %vm24_vm0, %v271_v36 }
0x17d3   :  { %v690_v19 = vpop.permute.xlu0 %689 }
0x17d4   :  { %1793 = vst.msk [vmem:[%s2941_s4 + $0x10] sm:$0xff] %vm24_vm0, %v690_v19 }
0x17d7   :  { %v1110_v41 = vpop.permute.xlu0 %1109 }
0x17d8   :  { %v2455_v63 = vpop.eup %2454  ;;  %1805 = vst.msk [vmem:[%s2941_s4 + $0x20] sm:$0xff] %vm24_vm0, %v1110_v41 }
0x17d9   :  { %1734 = vrot.lane.b32.xlu1 %v2455_v63, %s2459_s30 }
0x17db   :  { %v1530_v37 = vpop.permute.xlu0 %1529 }
0x17dc   :  { %1817 = vst.msk [vmem:[%s2941_s4 + $0x30] sm:$0xff] %vm24_vm0, %v1530_v37 }
0x17dd   :  { %479 = vrot.lane.b32.xlu1 %v2675_v60, %s2460_s7 }
0x17df   :  { %v1747_v39 = vpop.permute.xlu0 %1746 }
0x17e0   :  { %1749 = vst.msk [vmem:[#allocation3] sm:$0xff] %vm24_vm0, %v1747_v39  ;;  %1762 = vst.msk [vmem:[%s2942_s6] sm:$0xff] %vm24_vm0, %v1747_v39 }
0x17e1   :  { %899 = vrot.lane.b32.xlu1 %v2759_v20, %s2460_s7 }
0x17e5   :  { %1319 = vrot.lane.b32.xlu1 %v2836_v44, %s2460_s7 }
0x184b   :  { %v1735_v40 = vpop.permute.xlu1 %1734 }
0x184c   :  { %v1737_v42 = vmul.f32 %v2453_v29, %v1735_v40 }
0x184e   :  { %1739 = vrot.lane.b32.xlu1 %v1737_v42, %s2460_s7 }
0x184f   :  { %v480_v43 = vpop.permute.xlu1 %479 }
0x1850   :  { %1787 = vst.msk [vmem:[%s2941_s4 + $0x8] sm:$0xff] %vm24_vm0, %v480_v43 }
0x1852   :  { %1752 = vrot.lane.b32.xlu1 %v1731_v35, %s2461_s16 }
0x1853   :  { %v900_v60 = vpop.permute.xlu1 %899 }
0x1854   :  { %1799 = vst.msk [vmem:[%s2941_s4 + $0x18] sm:$0xff] %vm24_vm0, %v900_v60 }
0x1857   :  { %v1320_v20 = vpop.permute.xlu1 %1319 }
0x1858   :  { %1811 = vst.msk [vmem:[%s2941_s4 + $0x28] sm:$0xff] %vm24_vm0, %v1320_v20 }
0x18c0   :  { %v1740_v44 = vpop.permute.xlu1 %1739 }
0x18c1   :  { %1823 = vst.msk [vmem:[%s2941_s4 + $0x38] sm:$0xff] %vm24_vm0, %v1740_v44  ;;  %1750 = vst.msk [vmem:[#allocation2 + $0x8] sm:$0xff] %vm24_vm0, %v1740_v44 }
0x18c2   :  { %1824 = vst.msk [vmem:[%s2940_s5 + $0x8] sm:$0xff] %vm24_vm0, %v1740_v44 }
0x18c4   :  { %v1753_v46 = vpop.permute.xlu1 %1752 }
0x18c5   :  { %1755 = vst.msk [vmem:[#allocation3 + $0x8] sm:$0xff] %vm24_vm0, %v1753_v46  ;;  %1825 = vst.msk [vmem:[%s2942_s6 + $0x8] sm:$0xff] %vm24_vm0, %v1753_v46 }

</bundles_post_ra>
